<compile_context>
chip_gen: v5e
topology: v5e:2x2
jax: 0.10.0
libtpu: 0.0.40
codegen_flags: <defaults>
</compile_context>

<pallas_src>
import math
import functools

import jax
import jax.numpy as jnp
from jax.experimental import pallas as pl
from jax.experimental.pallas import tpu as pltpu

# MXU operand dtype.  bf16 roughly 2-4x matmul throughput on v5e/v6e/v7x and
# halves resident weight bytes; accumulation stays f32.  Set to jnp.float32 if
# exact numerical parity with the f32 PyTorch reference is required.
MATMUL_DTYPE = jnp.bfloat16


# ---------------------------------------------------------------------------
# In-kernel helpers
# ---------------------------------------------------------------------------
def _dot(a, b):
    """2-D matmul on the MXU with f32 accumulation."""
    return jnp.dot(a.astype(MATMUL_DTYPE), b.astype(MATMUL_DTYPE),
                   preferred_element_type=jnp.float32)


def _layernorm(z, g, b, eps):
    mu = jnp.mean(z, axis=-1, keepdims=True)
    var = jnp.mean((z - mu) ** 2, axis=-1, keepdims=True)
    return (z - mu) * jax.lax.rsqrt(var + eps) * g + b


# ---------------------------------------------------------------------------
# Fused kernel: embedding + PE + all encoder layers, one grid step == TB batch
# elements (activation rows are row-flattened to (TB*S, ...)).
# ---------------------------------------------------------------------------
def _fused_encoder_kernel(
        src_ref, pe_ref, emb_w_ref, emb_b_ref,
        qkv_w_ref, qkv_b_ref, o_w_ref, o_b_ref,
        ff1_w_ref, ff1_b_ref, ff2_w_ref, ff2_b_ref,
        ln1_g_ref, ln1_b_ref, ln2_g_ref, ln2_b_ref,
        o_ref,
        *, num_heads, num_layers, tile_batch, seq_len, eps):
    H, TB, S = num_heads, tile_batch, seq_len
    D = emb_w_ref.shape[1]
    Dh = D // H
    scale = 1.0 / math.sqrt(Dh)

    # --- embedding + positional encoding (dropout == identity at inference) ---
    x = _dot(src_ref[...], emb_w_ref[...]) + emb_b_ref[...]        # (TB*S, D) f32
    x = x + pe_ref[...]

    # --- encoder blocks (static unroll; weights resident in VMEM) ---
    for l in range(num_layers):
        # Fused QKV projection.  Columns were pre-permuted by the wrapper to
        # [Q | K | V] blocks, head-major inside each block.
        qkv = _dot(x, qkv_w_ref[l]) + qkv_b_ref[l]                 # (TB*S, 3D)
        # Leading-dim split only (no lane/sublane relayout; S % 8 == 0).
        qkv3 = qkv.reshape(TB, S, 3 * D)

        # Heads + batch folded into ONE leading einsum-batch dim (H*TB): all
        # attention matmuls and the softmax run as single batched ops.
        q = jnp.concatenate(
            [qkv3[:, :, h * Dh:(h + 1) * Dh] for h in range(H)], axis=0)
        k = jnp.concatenate(
            [qkv3[:, :, D + h * Dh:D + (h + 1) * Dh] for h in range(H)], axis=0)
        v = jnp.concatenate(
            [qkv3[:, :, 2 * D + h * Dh:2 * D + (h + 1) * Dh] for h in range(H)], axis=0)

        # q @ k^T expressed directly via einsum dimension numbers (no .T).
        logits = jnp.einsum('bqd,bkd->bqk',
                            q.astype(MATMUL_DTYPE), k.astype(MATMUL_DTYPE),
                            preferred_element_type=jnp.float32) * scale
        m = jnp.max(logits, axis=-1, keepdims=True)
        p = jnp.exp(logits - m)
        # approx reciprocal runs on the EUP slot (essentially free); use
        # approx=False if bit-level parity with the reference is required.
        inv = pl.reciprocal(jnp.sum(p, axis=-1, keepdims=True), approx=True)
        p = p * inv
        o_heads = jnp.einsum('bqk,bkd->bqd',
                             p.astype(MATMUL_DTYPE), v.astype(MATMUL_DTYPE),
                             preferred_element_type=jnp.float32)   # (H*TB, S, Dh)

        # Rebuild a lane-dense (TB*S, D) values tile (head-major columns, same
        # ordering the reference's permute+reshape produces).
        vals = jnp.concatenate(
            [o_heads[h * TB:(h + 1) * TB] for h in range(H)], axis=-1)   # (TB, S, D)
        vals = vals.reshape(TB * S, D)

        attn_out = _dot(vals, o_w_ref[l]) + o_b_ref[l]
        x = _layernorm(x + attn_out, ln1_g_ref[l], ln1_b_ref[l], eps)

        hdn = jnp.maximum(_dot(x, ff1_w_ref[l]) + ff1_b_ref[l], 0.0)
        ff = _dot(hdn, ff2_w_ref[l]) + ff2_b_ref[l]
        x = _layernorm(x + ff, ln2_g_ref[l], ln2_b_ref[l], eps)

    o_ref[...] = x.astype(o_ref.dtype)


# ---------------------------------------------------------------------------
# Wrapper: parameter packing, batch tiling and pallas_call
# ---------------------------------------------------------------------------
def transformer_with_pe(src, params, num_heads, *, tile_batch=None):
    bs, S, in_dim = src.shape
    emb_w = params["emb_w"]
    D = emb_w.shape[1]
    layers = params["layers"]
    L = len(layers)
    dff = layers[0]["ff1_w"].shape[1]
    out_w, out_b = params["out_w"], params["out_b"]
    assert out_w.shape[0] == S * D
    H = num_heads
    assert D % H == 0
    Dh = D // H

    # --- batch tiling: ~128 activation rows per grid step (capped at bs).
    # On v7x one may cap TB further so the parallel grid keeps both TCs busy.
    if tile_batch is None:
        tile_batch = max(1, min(bs, 128 // max(S, 1)))
    TB = int(tile_batch)
    bs_pad = ((bs + TB - 1) // TB) * TB
    n_steps = bs_pad // TB

    src_p = src if bs_pad == bs else jnp.pad(src, ((0, bs_pad - bs), (0, 0), (0, 0)))
    src_flat = src_p.reshape(bs_pad * S, in_dim)            # row-flattened batch
    pe_tiled = jnp.tile(params["pe"][:S], (TB, 1))          # (TB*S, D)
    emb_b = params["emb_b"].reshape(1, D)
    emb_w_c = emb_w.astype(MATMUL_DTYPE)

    # qkv column permutation: PyTorch per-head-interleaved [q_h|k_h|v_h]
    # (reshape(bs,S,H,3Dh) + chunk(3,-1)) -> [Q | K | V] blocks, head-major.
    def permute_qkv_w(w):                                    # (D, 3D)
        return w.reshape(D, H, 3, Dh).transpose(0, 2, 1, 3).reshape(D, 3 * D)

    def permute_qkv_b(b):                                    # (3D,)
        return b.reshape(H, 3, Dh).transpose(1, 0, 2).reshape(3 * D)

    def stack_w(name):                                       # matmul weights -> bf16
        return jnp.stack([lp[name] for lp in layers], axis=0).astype(MATMUL_DTYPE)

    def stack_v(name):                                       # biases / LN params stay f32
        return jnp.stack([lp[name] for lp in layers], axis=0)[:, None, :]

    qkv_w = jnp.stack([permute_qkv_w(lp["qkv_w"]) for lp in layers],
                      axis=0).astype(MATMUL_DTYPE)
    qkv_b = jnp.stack([permute_qkv_b(lp["qkv_b"]) for lp in layers],
                      axis=0)[:, None, :]
    o_w = stack_w("o_w");     o_b = stack_v("o_b")
    ff1_w = stack_w("ff1_w"); ff1_b = stack_v("ff1_b")
    ff2_w = stack_w("ff2_w"); ff2_b = stack_v("ff2_b")
    ln1_g = stack_v("ln1_g"); ln1_b = stack_v("ln1_b")
    ln2_g = stack_v("ln2_g"); ln2_b = stack_v("ln2_b")

    operands = (src_flat, pe_tiled, emb_w_c, emb_b,
                qkv_w, qkv_b, o_w, o_b, ff1_w, ff1_b, ff2_w, ff2_b,
                ln1_g, ln1_b, ln2_g, ln2_b)

    # --- VMEM budget derived from actual block sizes (2x for default double
    # buffering + 8 MiB headroom), capped at 64 MiB so it is valid on v7x too.
    def nbytes(a):
        return int(a.size) * a.dtype.itemsize
    per_step = (nbytes(src_flat) // n_steps
                + sum(nbytes(a) for a in operands[1:])
                + TB * S * D * 4)                            # output block (f32)
    vmem_limit = int(min(64 * 1024 * 1024, 2 * per_step + 8 * 1024 * 1024))

    zmap2 = lambda b: (0, 0)
    zmap3 = lambda b: (0, 0, 0)

    enc = pl.pallas_call(
        functools.partial(_fused_encoder_kernel,
                          num_heads=H, num_layers=L, tile_batch=TB,
                          seq_len=S, eps=1e-5),
        out_shape=jax.ShapeDtypeStruct((bs_pad * S, D), jnp.float32),
        grid=(n_steps,),
        in_specs=[
            pl.BlockSpec((TB * S, in_dim), lambda b: (b, 0)),   # src rows (per tile)
            pl.BlockSpec((TB * S, D), zmap2),                   # positional enc (tiled)
            pl.BlockSpec((in_dim, D), zmap2),                   # emb_w
            pl.BlockSpec((1, D), zmap2),                        # emb_b
            pl.BlockSpec((L, D, 3 * D), zmap3),                 # qkv_w  ([Q|K|V] blocks)
            pl.BlockSpec((L, 1, 3 * D), zmap3),                 # qkv_b
            pl.BlockSpec((L, D, D), zmap3),                     # o_w
            pl.BlockSpec((L, 1, D), zmap3),                     # o_b
            pl.BlockSpec((L, D, dff), zmap3),                   # ff1_w
            pl.BlockSpec((L, 1, dff), zmap3),                   # ff1_b
            pl.BlockSpec((L, dff, D), zmap3),                   # ff2_w
            pl.BlockSpec((L, 1, D), zmap3),                     # ff2_b
            pl.BlockSpec((L, 1, D), zmap3),                     # ln1_g
            pl.BlockSpec((L, 1, D), zmap3),                     # ln1_b
            pl.BlockSpec((L, 1, D), zmap3),                     # ln2_g
            pl.BlockSpec((L, 1, D), zmap3),                     # ln2_b
        ],
        out_specs=pl.BlockSpec((TB * S, D), lambda b: (b, 0)),
        compiler_params=pltpu.CompilerParams(
            dimension_semantics=("parallel",),                  # batch tiles across TCs
            vmem_limit_bytes=vmem_limit,
        ),
    )(*operands)

    # --- flatten + LazyLinear as ONE full-batch XLA GEMM: full MXU row fill,
    # no serialized per-row loop, and out_w never occupies kernel VMEM.
    enc = enc.reshape(bs_pad, S * D)[:bs]
    return enc @ out_w + out_b


# ---------------------------------------------------------------------------
# Deterministic parameter init (xavier-uniform weights, zero biases)
# ---------------------------------------------------------------------------
def make_positional_encoding(max_len, d_model):
    position = jnp.arange(max_len, dtype=jnp.float32)[:, None]
    div_term = jnp.exp(
        jnp.arange(0, d_model, 2, dtype=jnp.float32) * (-math.log(10000.0) / d_model)
    )
    pe = jnp.zeros((max_len, d_model), dtype=jnp.float32)
    pe = pe.at[:, 0::2].set(jnp.sin(position * div_term))
    pe = pe.at[:, 1::2].set(jnp.cos(position * div_term))
    return pe


def xavier_uniform(key, fan_in, fan_out):
    limit = math.sqrt(6.0 / (fan_in + fan_out))
    return jax.random.uniform(key, (fan_in, fan_out), jnp.float32, -limit, limit)


def init_params(key, in_dim, out_dim, embed_dim, num_heads, num_layers, seq_len):
    keys = jax.random.split(key, 2 + 4 * num_layers)
    ki = iter(range(len(keys)))
    params = {
        "emb_w": xavier_uniform(keys[next(ki)], in_dim, embed_dim),
        "emb_b": jnp.zeros((embed_dim,), jnp.float32),
        "pe": make_positional_encoding(seq_len, embed_dim),
        "layers": [],
        "out_w": xavier_uniform(keys[next(ki)], seq_len * embed_dim, out_dim),
        "out_b": jnp.zeros((out_dim,), jnp.float32),
    }
    dff = embed_dim  # dim_feedforward = embed_dim in TransformerWithPE
    for _ in range(num_layers):
        lp = {
            "qkv_w": xavier_uniform(keys[next(ki)], embed_dim, 3 * embed_dim),
            "qkv_b": jnp.zeros((3 * embed_dim,), jnp.float32),
            "o_w": xavier_uniform(keys[next(ki)], embed_dim, embed_dim),
            "o_b": jnp.zeros((embed_dim,), jnp.float32),
            "ff1_w": xavier_uniform(keys[next(ki)], embed_dim, dff),
            "ff1_b": jnp.zeros((dff,), jnp.float32),
            "ff2_w": xavier_uniform(keys[next(ki)], dff, embed_dim),
            "ff2_b": jnp.zeros((embed_dim,), jnp.float32),
            "ln1_g": jnp.ones((embed_dim,), jnp.float32),
            "ln1_b": jnp.zeros((embed_dim,), jnp.float32),
            "ln2_g": jnp.ones((embed_dim,), jnp.float32),
            "ln2_b": jnp.zeros((embed_dim,), jnp.float32),
        }
        params["layers"].append(lp)
    return params


if __name__ == "__main__":
    bs, seq, in_dim = 2, 8, 4
    embed_dim, num_heads, num_layers, out_dim = 32, 4, 2, 8

    key = jax.random.PRNGKey(0)
    k_src, k_params = jax.random.split(key)
    src = jax.random.normal(k_src, (bs, seq, in_dim), dtype=jnp.float32)
    params = init_params(k_params, in_dim, out_dim, embed_dim, num_heads,
                         num_layers, seq)

    out = transformer_with_pe(src, params, num_heads)
    out = jax.block_until_ready(out)
    assert out.shape == (bs, out_dim), out.shape
    assert bool(jnp.all(jnp.isfinite(out)))
    # TODO(synk): dropout (p=0.1 in PositionalEncoding) is identity here — inference mode only.
    print("KERNEL_OK")
</pallas_src>

<mosaic_0001>
module attributes {stable_mosaic.version = 11 : i64} {
  func.func @_fused_encoder_kernel(%arg0: i32, %arg1: memref<16x4xf32, #tpu.memory_space<vmem>>, %arg2: memref<16x32xf32, #tpu.memory_space<vmem>>, %arg3: memref<4x32xbf16, #tpu.memory_space<vmem>>, %arg4: memref<1x32xf32, #tpu.memory_space<vmem>>, %arg5: memref<2x32x96xbf16, #tpu.memory_space<vmem>>, %arg6: memref<2x1x96xf32, #tpu.memory_space<vmem>>, %arg7: memref<2x32x32xbf16, #tpu.memory_space<vmem>>, %arg8: memref<2x1x32xf32, #tpu.memory_space<vmem>>, %arg9: memref<2x32x32xbf16, #tpu.memory_space<vmem>>, %arg10: memref<2x1x32xf32, #tpu.memory_space<vmem>>, %arg11: memref<2x32x32xbf16, #tpu.memory_space<vmem>>, %arg12: memref<2x1x32xf32, #tpu.memory_space<vmem>>, %arg13: memref<2x1x32xf32, #tpu.memory_space<vmem>>, %arg14: memref<2x1x32xf32, #tpu.memory_space<vmem>>, %arg15: memref<2x1x32xf32, #tpu.memory_space<vmem>>, %arg16: memref<2x1x32xf32, #tpu.memory_space<vmem>>, %arg17: memref<16x32xf32, #tpu.memory_space<vmem>>) attributes {dimension_semantics = [#tpu.dimension_semantics<parallel>], iteration_bounds = array<i64: 1>, scalar_prefetch = 0 : i64, scratch_operands = 0 : i64, tpu.core_type = #tpu.core_type<tc>, window_params = [{transform_indices = @transform_0, window_bounds = array<i64: 16, 4>}, {pipeline_mode = #tpu.pipeline_mode<synchronous>, transform_indices = @transform_1, window_bounds = array<i64: 16, 32>}, {pipeline_mode = #tpu.pipeline_mode<synchronous>, transform_indices = @transform_2, window_bounds = array<i64: 4, 32>}, {pipeline_mode = #tpu.pipeline_mode<synchronous>, transform_indices = @transform_3, window_bounds = array<i64: 1, 32>}, {pipeline_mode = #tpu.pipeline_mode<synchronous>, transform_indices = @transform_4, window_bounds = array<i64: 2, 32, 96>}, {pipeline_mode = #tpu.pipeline_mode<synchronous>, transform_indices = @transform_5, window_bounds = array<i64: 2, 1, 96>}, {pipeline_mode = #tpu.pipeline_mode<synchronous>, transform_indices = @transform_6, window_bounds = array<i64: 2, 32, 32>}, {pipeline_mode = #tpu.pipeline_mode<synchronous>, transform_indices = @transform_7, window_bounds = array<i64: 2, 1, 32>}, {pipeline_mode = #tpu.pipeline_mode<synchronous>, transform_indices = @transform_8, window_bounds = array<i64: 2, 32, 32>}, {pipeline_mode = #tpu.pipeline_mode<synchronous>, transform_indices = @transform_9, window_bounds = array<i64: 2, 1, 32>}, {pipeline_mode = #tpu.pipeline_mode<synchronous>, transform_indices = @transform_10, window_bounds = array<i64: 2, 32, 32>}, {pipeline_mode = #tpu.pipeline_mode<synchronous>, transform_indices = @transform_11, window_bounds = array<i64: 2, 1, 32>}, {pipeline_mode = #tpu.pipeline_mode<synchronous>, transform_indices = @transform_12, window_bounds = array<i64: 2, 1, 32>}, {pipeline_mode = #tpu.pipeline_mode<synchronous>, transform_indices = @transform_13, window_bounds = array<i64: 2, 1, 32>}, {pipeline_mode = #tpu.pipeline_mode<synchronous>, transform_indices = @transform_14, window_bounds = array<i64: 2, 1, 32>}, {pipeline_mode = #tpu.pipeline_mode<synchronous>, transform_indices = @transform_15, window_bounds = array<i64: 2, 1, 32>}, {transform_indices = @transform_16, window_bounds = array<i64: 16, 32>}]} {
    %c0 = arith.constant 0 : index
    %c0_0 = arith.constant 0 : index
    %0 = vector.load %arg1[%c0, %c0_0] : memref<16x4xf32, #tpu.memory_space<vmem>>, vector<16x4xf32>
    %c0_1 = arith.constant 0 : index
    %c0_2 = arith.constant 0 : index
    %1 = vector.load %arg3[%c0_1, %c0_2] : memref<4x32xbf16, #tpu.memory_space<vmem>>, vector<4x32xbf16>
    %2 = arith.truncf %0 : vector<16x4xf32> to vector<16x4xbf16>
    %cst = arith.constant dense<0.000000e+00> : vector<16x32xf32>
    %3 = tpu.matmul %2, %1, %cst {dimension_numbers = #tpu.dot_dimension_numbers<[1], [0], [0], [1], [0, 0, 1, 1], [], []>} : vector<16x4xbf16>, vector<4x32xbf16>, vector<16x32xf32> -> vector<16x32xf32>
    %c0_3 = arith.constant 0 : index
    %c0_4 = arith.constant 0 : index
    %4 = vector.load %arg4[%c0_3, %c0_4] : memref<1x32xf32, #tpu.memory_space<vmem>>, vector<1x32xf32>
    %5 = vector.broadcast %4 : vector<1x32xf32> to vector<16x32xf32>
    %6 = arith.addf %3, %5 : vector<16x32xf32>
    %c0_5 = arith.constant 0 : index
    %c0_6 = arith.constant 0 : index
    %7 = vector.load %arg2[%c0_5, %c0_6] : memref<16x32xf32, #tpu.memory_space<vmem>>, vector<16x32xf32>
    %8 = arith.addf %6, %7 : vector<16x32xf32>
    %c0_7 = arith.constant 0 : index
    %c0_8 = arith.constant 0 : index
    %c0_9 = arith.constant 0 : index
    %9 = vector.load %arg5[%c0_7, %c0_8, %c0_9] : memref<2x32x96xbf16, #tpu.memory_space<vmem>>, vector<1x32x96xbf16>
    %10 = vector.shape_cast %9 : vector<1x32x96xbf16> to vector<32x96xbf16>
    %11 = arith.truncf %8 : vector<16x32xf32> to vector<16x32xbf16>
    %cst_10 = arith.constant dense<0.000000e+00> : vector<16x96xf32>
    %12 = tpu.matmul %11, %10, %cst_10 {dimension_numbers = #tpu.dot_dimension_numbers<[1], [0], [0], [1], [0, 0, 1, 1], [], []>} : vector<16x32xbf16>, vector<32x96xbf16>, vector<16x96xf32> -> vector<16x96xf32>
    %c0_11 = arith.constant 0 : index
    %c0_12 = arith.constant 0 : index
    %c0_13 = arith.constant 0 : index
    %13 = vector.load %arg6[%c0_11, %c0_12, %c0_13] : memref<2x1x96xf32, #tpu.memory_space<vmem>>, vector<1x1x96xf32>
    %14 = vector.shape_cast %13 : vector<1x1x96xf32> to vector<1x96xf32>
    %15 = vector.broadcast %14 : vector<1x96xf32> to vector<16x96xf32>
    %16 = arith.addf %12, %15 : vector<16x96xf32>
    %17 = vector.shape_cast %16 : vector<16x96xf32> to vector<2x8x96xf32>
    %18 = vector.extract_strided_slice %17 {offsets = [0, 0, 0], sizes = [2, 8, 8], strides = [1, 1, 1]} : vector<2x8x96xf32> to vector<2x8x8xf32>
    %19 = vector.extract_strided_slice %17 {offsets = [0, 0, 8], sizes = [2, 8, 8], strides = [1, 1, 1]} : vector<2x8x96xf32> to vector<2x8x8xf32>
    %20 = vector.extract_strided_slice %17 {offsets = [0, 0, 16], sizes = [2, 8, 8], strides = [1, 1, 1]} : vector<2x8x96xf32> to vector<2x8x8xf32>
    %21 = vector.extract_strided_slice %17 {offsets = [0, 0, 24], sizes = [2, 8, 8], strides = [1, 1, 1]} : vector<2x8x96xf32> to vector<2x8x8xf32>
    %22 = tpu.concatenate %18, %19, %20, %21 in 0 : vector<2x8x8xf32>, vector<2x8x8xf32>, vector<2x8x8xf32>, vector<2x8x8xf32> -> vector<8x8x8xf32>
    %23 = vector.extract_strided_slice %17 {offsets = [0, 0, 32], sizes = [2, 8, 8], strides = [1, 1, 1]} : vector<2x8x96xf32> to vector<2x8x8xf32>
    %24 = vector.extract_strided_slice %17 {offsets = [0, 0, 40], sizes = [2, 8, 8], strides = [1, 1, 1]} : vector<2x8x96xf32> to vector<2x8x8xf32>
    %25 = vector.extract_strided_slice %17 {offsets = [0, 0, 48], sizes = [2, 8, 8], strides = [1, 1, 1]} : vector<2x8x96xf32> to vector<2x8x8xf32>
    %26 = vector.extract_strided_slice %17 {offsets = [0, 0, 56], sizes = [2, 8, 8], strides = [1, 1, 1]} : vector<2x8x96xf32> to vector<2x8x8xf32>
    %27 = tpu.concatenate %23, %24, %25, %26 in 0 : vector<2x8x8xf32>, vector<2x8x8xf32>, vector<2x8x8xf32>, vector<2x8x8xf32> -> vector<8x8x8xf32>
    %28 = vector.extract_strided_slice %17 {offsets = [0, 0, 64], sizes = [2, 8, 8], strides = [1, 1, 1]} : vector<2x8x96xf32> to vector<2x8x8xf32>
    %29 = vector.extract_strided_slice %17 {offsets = [0, 0, 72], sizes = [2, 8, 8], strides = [1, 1, 1]} : vector<2x8x96xf32> to vector<2x8x8xf32>
    %30 = vector.extract_strided_slice %17 {offsets = [0, 0, 80], sizes = [2, 8, 8], strides = [1, 1, 1]} : vector<2x8x96xf32> to vector<2x8x8xf32>
    %31 = vector.extract_strided_slice %17 {offsets = [0, 0, 88], sizes = [2, 8, 8], strides = [1, 1, 1]} : vector<2x8x96xf32> to vector<2x8x8xf32>
    %32 = tpu.concatenate %28, %29, %30, %31 in 0 : vector<2x8x8xf32>, vector<2x8x8xf32>, vector<2x8x8xf32>, vector<2x8x8xf32> -> vector<8x8x8xf32>
    %33 = arith.truncf %22 : vector<8x8x8xf32> to vector<8x8x8xbf16>
    %34 = arith.truncf %27 : vector<8x8x8xf32> to vector<8x8x8xbf16>
    "tpu.trace_start"() <{level = 10 : i32, message = "bqd,bkd->bqk"}> : () -> ()
    %cst_14 = arith.constant dense<0.000000e+00> : vector<8x8x8xf32>
    %35 = tpu.matmul %33, %34, %cst_14 {dimension_numbers = #tpu.dot_dimension_numbers<[2], [2], [1], [1], [0, 0, 0, 1, 1, 1], [0], [0]>} : vector<8x8x8xbf16>, vector<8x8x8xbf16>, vector<8x8x8xf32> -> vector<8x8x8xf32>
    "tpu.trace_stop"() : () -> ()
    %cst_15 = arith.constant 0.353553385 : f32
    %36 = vector.broadcast %cst_15 : f32 to vector<8x8x8xf32>
    %37 = arith.mulf %35, %36 : vector<8x8x8xf32>
    %cst_16 = arith.constant dense<0xFF800000> : vector<8x8xf32>
    %38 = vector.multi_reduction <maximumf>, %37, %cst_16 [2] : vector<8x8x8xf32> to vector<8x8xf32>
    %39 = vector.shape_cast %38 : vector<8x8xf32> to vector<8x8x1xf32>
    %40 = vector.broadcast %39 : vector<8x8x1xf32> to vector<8x8x8xf32>
    %41 = arith.subf %37, %40 : vector<8x8x8xf32>
    %42 = math.exp %41 : vector<8x8x8xf32>
    %cst_17 = arith.constant dense<0.000000e+00> : vector<8x8xf32>
    %43 = vector.multi_reduction <add>, %42, %cst_17 [2] : vector<8x8x8xf32> to vector<8x8xf32>
    %44 = vector.shape_cast %43 : vector<8x8xf32> to vector<8x8x1xf32>
    %45 = tpu.reciprocal %44 {approx = true} : vector<8x8x1xf32> -> vector<8x8x1xf32>
    %46 = vector.broadcast %45 : vector<8x8x1xf32> to vector<8x8x8xf32>
    %47 = arith.mulf %42, %46 : vector<8x8x8xf32>
    %48 = arith.truncf %47 : vector<8x8x8xf32> to vector<8x8x8xbf16>
    %49 = arith.truncf %32 : vector<8x8x8xf32> to vector<8x8x8xbf16>
    "tpu.trace_start"() <{level = 10 : i32, message = "bqk,bkd->bqd"}> : () -> ()
    %cst_18 = arith.constant dense<0.000000e+00> : vector<8x8x8xf32>
    %50 = tpu.matmul %48, %49, %cst_18 {dimension_numbers = #tpu.dot_dimension_numbers<[2], [1], [1], [2], [0, 0, 0, 1, 1, 2], [0], [0]>} : vector<8x8x8xbf16>, vector<8x8x8xbf16>, vector<8x8x8xf32> -> vector<8x8x8xf32>
    "tpu.trace_stop"() : () -> ()
    %51 = vector.extract_strided_slice %50 {offsets = [0, 0, 0], sizes = [2, 8, 8], strides = [1, 1, 1]} : vector<8x8x8xf32> to vector<2x8x8xf32>
    %52 = vector.extract_strided_slice %50 {offsets = [2, 0, 0], sizes = [2, 8, 8], strides = [1, 1, 1]} : vector<8x8x8xf32> to vector<2x8x8xf32>
    %53 = vector.extract_strided_slice %50 {offsets = [4, 0, 0], sizes = [2, 8, 8], strides = [1, 1, 1]} : vector<8x8x8xf32> to vector<2x8x8xf32>
    %54 = vector.extract_strided_slice %50 {offsets = [6, 0, 0], sizes = [2, 8, 8], strides = [1, 1, 1]} : vector<8x8x8xf32> to vector<2x8x8xf32>
    %55 = tpu.concatenate %51, %52, %53, %54 in 2 : vector<2x8x8xf32>, vector<2x8x8xf32>, vector<2x8x8xf32>, vector<2x8x8xf32> -> vector<2x8x32xf32>
    %56 = vector.shape_cast %55 : vector<2x8x32xf32> to vector<16x32xf32>
    %c0_19 = arith.constant 0 : index
    %c0_20 = arith.constant 0 : index
    %c0_21 = arith.constant 0 : index
    %57 = vector.load %arg7[%c0_19, %c0_20, %c0_21] : memref<2x32x32xbf16, #tpu.memory_space<vmem>>, vector<1x32x32xbf16>
    %58 = vector.shape_cast %57 : vector<1x32x32xbf16> to vector<32x32xbf16>
    %59 = arith.truncf %56 : vector<16x32xf32> to vector<16x32xbf16>
    %cst_22 = arith.constant dense<0.000000e+00> : vector<16x32xf32>
    %60 = tpu.matmul %59, %58, %cst_22 {dimension_numbers = #tpu.dot_dimension_numbers<[1], [0], [0], [1], [0, 0, 1, 1], [], []>} : vector<16x32xbf16>, vector<32x32xbf16>, vector<16x32xf32> -> vector<16x32xf32>
    %c0_23 = arith.constant 0 : index
    %c0_24 = arith.constant 0 : index
    %c0_25 = arith.constant 0 : index
    %61 = vector.load %arg8[%c0_23, %c0_24, %c0_25] : memref<2x1x32xf32, #tpu.memory_space<vmem>>, vector<1x1x32xf32>
    %62 = vector.shape_cast %61 : vector<1x1x32xf32> to vector<1x32xf32>
    %63 = vector.broadcast %62 : vector<1x32xf32> to vector<16x32xf32>
    %64 = arith.addf %60, %63 : vector<16x32xf32>
    %65 = arith.addf %8, %64 : vector<16x32xf32>
    %c0_26 = arith.constant 0 : index
    %c0_27 = arith.constant 0 : index
    %c0_28 = arith.constant 0 : index
    %66 = vector.load %arg13[%c0_26, %c0_27, %c0_28] : memref<2x1x32xf32, #tpu.memory_space<vmem>>, vector<1x1x32xf32>
    %67 = vector.shape_cast %66 : vector<1x1x32xf32> to vector<1x32xf32>
    %c0_29 = arith.constant 0 : index
    %c0_30 = arith.constant 0 : index
    %c0_31 = arith.constant 0 : index
    %68 = vector.load %arg14[%c0_29, %c0_30, %c0_31] : memref<2x1x32xf32, #tpu.memory_space<vmem>>, vector<1x1x32xf32>
    %69 = vector.shape_cast %68 : vector<1x1x32xf32> to vector<1x32xf32>
    %cst_32 = arith.constant dense<0.000000e+00> : vector<16xf32>
    %70 = vector.multi_reduction <add>, %65, %cst_32 [1] : vector<16x32xf32> to vector<16xf32>
    %71 = vector.shape_cast %70 : vector<16xf32> to vector<16x1xf32>
    %cst_33 = arith.constant 3.200000e+01 : f32
    %72 = vector.broadcast %cst_33 : f32 to vector<16x1xf32>
    %73 = arith.divf %71, %72 : vector<16x1xf32>
    %74 = vector.broadcast %73 : vector<16x1xf32> to vector<16x32xf32>
    %75 = arith.subf %65, %74 : vector<16x32xf32>
    %76 = arith.mulf %75, %75 : vector<16x32xf32>
    %cst_34 = arith.constant dense<0.000000e+00> : vector<16xf32>
    %77 = vector.multi_reduction <add>, %76, %cst_34 [1] : vector<16x32xf32> to vector<16xf32>
    %78 = vector.shape_cast %77 : vector<16xf32> to vector<16x1xf32>
    %cst_35 = arith.constant 3.200000e+01 : f32
    %79 = vector.broadcast %cst_35 : f32 to vector<16x1xf32>
    %80 = arith.divf %78, %79 : vector<16x1xf32>
    %81 = vector.broadcast %73 : vector<16x1xf32> to vector<16x32xf32>
    %82 = arith.subf %65, %81 : vector<16x32xf32>
    %cst_36 = arith.constant 9.99999974E-6 : f32
    %83 = vector.broadcast %cst_36 : f32 to vector<16x1xf32>
    %84 = arith.addf %80, %83 : vector<16x1xf32>
    %85 = math.rsqrt %84 : vector<16x1xf32>
    %86 = vector.broadcast %85 : vector<16x1xf32> to vector<16x32xf32>
    %87 = arith.mulf %82, %86 : vector<16x32xf32>
    %88 = vector.broadcast %67 : vector<1x32xf32> to vector<16x32xf32>
    %89 = arith.mulf %87, %88 : vector<16x32xf32>
    %90 = vector.broadcast %69 : vector<1x32xf32> to vector<16x32xf32>
    %91 = arith.addf %89, %90 : vector<16x32xf32>
    %c0_37 = arith.constant 0 : index
    %c0_38 = arith.constant 0 : index
    %c0_39 = arith.constant 0 : index
    %92 = vector.load %arg9[%c0_37, %c0_38, %c0_39] : memref<2x32x32xbf16, #tpu.memory_space<vmem>>, vector<1x32x32xbf16>
    %93 = vector.shape_cast %92 : vector<1x32x32xbf16> to vector<32x32xbf16>
    %94 = arith.truncf %91 : vector<16x32xf32> to vector<16x32xbf16>
    %cst_40 = arith.constant dense<0.000000e+00> : vector<16x32xf32>
    %95 = tpu.matmul %94, %93, %cst_40 {dimension_numbers = #tpu.dot_dimension_numbers<[1], [0], [0], [1], [0, 0, 1, 1], [], []>} : vector<16x32xbf16>, vector<32x32xbf16>, vector<16x32xf32> -> vector<16x32xf32>
    %c0_41 = arith.constant 0 : index
    %c0_42 = arith.constant 0 : index
    %c0_43 = arith.constant 0 : index
    %96 = vector.load %arg10[%c0_41, %c0_42, %c0_43] : memref<2x1x32xf32, #tpu.memory_space<vmem>>, vector<1x1x32xf32>
    %97 = vector.shape_cast %96 : vector<1x1x32xf32> to vector<1x32xf32>
    %98 = vector.broadcast %97 : vector<1x32xf32> to vector<16x32xf32>
    %99 = arith.addf %95, %98 : vector<16x32xf32>
    %cst_44 = arith.constant 0.000000e+00 : f32
    %100 = vector.broadcast %cst_44 : f32 to vector<16x32xf32>
    %101 = arith.maximumf %99, %100 : vector<16x32xf32>
    %c0_45 = arith.constant 0 : index
    %c0_46 = arith.constant 0 : index
    %c0_47 = arith.constant 0 : index
    %102 = vector.load %arg11[%c0_45, %c0_46, %c0_47] : memref<2x32x32xbf16, #tpu.memory_space<vmem>>, vector<1x32x32xbf16>
    %103 = vector.shape_cast %102 : vector<1x32x32xbf16> to vector<32x32xbf16>
    %104 = arith.truncf %101 : vector<16x32xf32> to vector<16x32xbf16>
    %cst_48 = arith.constant dense<0.000000e+00> : vector<16x32xf32>
    %105 = tpu.matmul %104, %103, %cst_48 {dimension_numbers = #tpu.dot_dimension_numbers<[1], [0], [0], [1], [0, 0, 1, 1], [], []>} : vector<16x32xbf16>, vector<32x32xbf16>, vector<16x32xf32> -> vector<16x32xf32>
    %c0_49 = arith.constant 0 : index
    %c0_50 = arith.constant 0 : index
    %c0_51 = arith.constant 0 : index
    %106 = vector.load %arg12[%c0_49, %c0_50, %c0_51] : memref<2x1x32xf32, #tpu.memory_space<vmem>>, vector<1x1x32xf32>
    %107 = vector.shape_cast %106 : vector<1x1x32xf32> to vector<1x32xf32>
    %108 = vector.broadcast %107 : vector<1x32xf32> to vector<16x32xf32>
    %109 = arith.addf %105, %108 : vector<16x32xf32>
    %110 = arith.addf %91, %109 : vector<16x32xf32>
    %c0_52 = arith.constant 0 : index
    %c0_53 = arith.constant 0 : index
    %c0_54 = arith.constant 0 : index
    %111 = vector.load %arg15[%c0_52, %c0_53, %c0_54] : memref<2x1x32xf32, #tpu.memory_space<vmem>>, vector<1x1x32xf32>
    %112 = vector.shape_cast %111 : vector<1x1x32xf32> to vector<1x32xf32>
    %c0_55 = arith.constant 0 : index
    %c0_56 = arith.constant 0 : index
    %c0_57 = arith.constant 0 : index
    %113 = vector.load %arg16[%c0_55, %c0_56, %c0_57] : memref<2x1x32xf32, #tpu.memory_space<vmem>>, vector<1x1x32xf32>
    %114 = vector.shape_cast %113 : vector<1x1x32xf32> to vector<1x32xf32>
    %cst_58 = arith.constant dense<0.000000e+00> : vector<16xf32>
    %115 = vector.multi_reduction <add>, %110, %cst_58 [1] : vector<16x32xf32> to vector<16xf32>
    %116 = vector.shape_cast %115 : vector<16xf32> to vector<16x1xf32>
    %cst_59 = arith.constant 3.200000e+01 : f32
    %117 = vector.broadcast %cst_59 : f32 to vector<16x1xf32>
    %118 = arith.divf %116, %117 : vector<16x1xf32>
    %119 = vector.broadcast %118 : vector<16x1xf32> to vector<16x32xf32>
    %120 = arith.subf %110, %119 : vector<16x32xf32>
    %121 = arith.mulf %120, %120 : vector<16x32xf32>
    %cst_60 = arith.constant dense<0.000000e+00> : vector<16xf32>
    %122 = vector.multi_reduction <add>, %121, %cst_60 [1] : vector<16x32xf32> to vector<16xf32>
    %123 = vector.shape_cast %122 : vector<16xf32> to vector<16x1xf32>
    %cst_61 = arith.constant 3.200000e+01 : f32
    %124 = vector.broadcast %cst_61 : f32 to vector<16x1xf32>
    %125 = arith.divf %123, %124 : vector<16x1xf32>
    %126 = vector.broadcast %118 : vector<16x1xf32> to vector<16x32xf32>
    %127 = arith.subf %110, %126 : vector<16x32xf32>
    %cst_62 = arith.constant 9.99999974E-6 : f32
    %128 = vector.broadcast %cst_62 : f32 to vector<16x1xf32>
    %129 = arith.addf %125, %128 : vector<16x1xf32>
    %130 = math.rsqrt %129 : vector<16x1xf32>
    %131 = vector.broadcast %130 : vector<16x1xf32> to vector<16x32xf32>
    %132 = arith.mulf %127, %131 : vector<16x32xf32>
    %133 = vector.broadcast %112 : vector<1x32xf32> to vector<16x32xf32>
    %134 = arith.mulf %132, %133 : vector<16x32xf32>
    %135 = vector.broadcast %114 : vector<1x32xf32> to vector<16x32xf32>
    %136 = arith.addf %134, %135 : vector<16x32xf32>
    %c1 = arith.constant 1 : index
    %c0_63 = arith.constant 0 : index
    %c0_64 = arith.constant 0 : index
    %137 = vector.load %arg5[%c1, %c0_63, %c0_64] : memref<2x32x96xbf16, #tpu.memory_space<vmem>>, vector<1x32x96xbf16>
    %138 = vector.shape_cast %137 : vector<1x32x96xbf16> to vector<32x96xbf16>
    %139 = arith.truncf %136 : vector<16x32xf32> to vector<16x32xbf16>
    %cst_65 = arith.constant dense<0.000000e+00> : vector<16x96xf32>
    %140 = tpu.matmul %139, %138, %cst_65 {dimension_numbers = #tpu.dot_dimension_numbers<[1], [0], [0], [1], [0, 0, 1, 1], [], []>} : vector<16x32xbf16>, vector<32x96xbf16>, vector<16x96xf32> -> vector<16x96xf32>
    %c1_66 = arith.constant 1 : index
    %c0_67 = arith.constant 0 : index
    %c0_68 = arith.constant 0 : index
    %141 = vector.load %arg6[%c1_66, %c0_67, %c0_68] : memref<2x1x96xf32, #tpu.memory_space<vmem>>, vector<1x1x96xf32>
    %142 = vector.shape_cast %141 : vector<1x1x96xf32> to vector<1x96xf32>
    %143 = vector.broadcast %142 : vector<1x96xf32> to vector<16x96xf32>
    %144 = arith.addf %140, %143 : vector<16x96xf32>
    %145 = vector.shape_cast %144 : vector<16x96xf32> to vector<2x8x96xf32>
    %146 = vector.extract_strided_slice %145 {offsets = [0, 0, 0], sizes = [2, 8, 8], strides = [1, 1, 1]} : vector<2x8x96xf32> to vector<2x8x8xf32>
    %147 = vector.extract_strided_slice %145 {offsets = [0, 0, 8], sizes = [2, 8, 8], strides = [1, 1, 1]} : vector<2x8x96xf32> to vector<2x8x8xf32>
    %148 = vector.extract_strided_slice %145 {offsets = [0, 0, 16], sizes = [2, 8, 8], strides = [1, 1, 1]} : vector<2x8x96xf32> to vector<2x8x8xf32>
    %149 = vector.extract_strided_slice %145 {offsets = [0, 0, 24], sizes = [2, 8, 8], strides = [1, 1, 1]} : vector<2x8x96xf32> to vector<2x8x8xf32>
    %150 = tpu.concatenate %146, %147, %148, %149 in 0 : vector<2x8x8xf32>, vector<2x8x8xf32>, vector<2x8x8xf32>, vector<2x8x8xf32> -> vector<8x8x8xf32>
    %151 = vector.extract_strided_slice %145 {offsets = [0, 0, 32], sizes = [2, 8, 8], strides = [1, 1, 1]} : vector<2x8x96xf32> to vector<2x8x8xf32>
    %152 = vector.extract_strided_slice %145 {offsets = [0, 0, 40], sizes = [2, 8, 8], strides = [1, 1, 1]} : vector<2x8x96xf32> to vector<2x8x8xf32>
    %153 = vector.extract_strided_slice %145 {offsets = [0, 0, 48], sizes = [2, 8, 8], strides = [1, 1, 1]} : vector<2x8x96xf32> to vector<2x8x8xf32>
    %154 = vector.extract_strided_slice %145 {offsets = [0, 0, 56], sizes = [2, 8, 8], strides = [1, 1, 1]} : vector<2x8x96xf32> to vector<2x8x8xf32>
    %155 = tpu.concatenate %151, %152, %153, %154 in 0 : vector<2x8x8xf32>, vector<2x8x8xf32>, vector<2x8x8xf32>, vector<2x8x8xf32> -> vector<8x8x8xf32>
    %156 = vector.extract_strided_slice %145 {offsets = [0, 0, 64], sizes = [2, 8, 8], strides = [1, 1, 1]} : vector<2x8x96xf32> to vector<2x8x8xf32>
    %157 = vector.extract_strided_slice %145 {offsets = [0, 0, 72], sizes = [2, 8, 8], strides = [1, 1, 1]} : vector<2x8x96xf32> to vector<2x8x8xf32>
    %158 = vector.extract_strided_slice %145 {offsets = [0, 0, 80], sizes = [2, 8, 8], strides = [1, 1, 1]} : vector<2x8x96xf32> to vector<2x8x8xf32>
    %159 = vector.extract_strided_slice %145 {offsets = [0, 0, 88], sizes = [2, 8, 8], strides = [1, 1, 1]} : vector<2x8x96xf32> to vector<2x8x8xf32>
    %160 = tpu.concatenate %156, %157, %158, %159 in 0 : vector<2x8x8xf32>, vector<2x8x8xf32>, vector<2x8x8xf32>, vector<2x8x8xf32> -> vector<8x8x8xf32>
    %161 = arith.truncf %150 : vector<8x8x8xf32> to vector<8x8x8xbf16>
    %162 = arith.truncf %155 : vector<8x8x8xf32> to vector<8x8x8xbf16>
    "tpu.trace_start"() <{level = 10 : i32, message = "bqd,bkd->bqk"}> : () -> ()
    %cst_69 = arith.constant dense<0.000000e+00> : vector<8x8x8xf32>
    %163 = tpu.matmul %161, %162, %cst_69 {dimension_numbers = #tpu.dot_dimension_numbers<[2], [2], [1], [1], [0, 0, 0, 1, 1, 1], [0], [0]>} : vector<8x8x8xbf16>, vector<8x8x8xbf16>, vector<8x8x8xf32> -> vector<8x8x8xf32>
    "tpu.trace_stop"() : () -> ()
    %cst_70 = arith.constant 0.353553385 : f32
    %164 = vector.broadcast %cst_70 : f32 to vector<8x8x8xf32>
    %165 = arith.mulf %163, %164 : vector<8x8x8xf32>
    %cst_71 = arith.constant dense<0xFF800000> : vector<8x8xf32>
    %166 = vector.multi_reduction <maximumf>, %165, %cst_71 [2] : vector<8x8x8xf32> to vector<8x8xf32>
    %167 = vector.shape_cast %166 : vector<8x8xf32> to vector<8x8x1xf32>
    %168 = vector.broadcast %167 : vector<8x8x1xf32> to vector<8x8x8xf32>
    %169 = arith.subf %165, %168 : vector<8x8x8xf32>
    %170 = math.exp %169 : vector<8x8x8xf32>
    %cst_72 = arith.constant dense<0.000000e+00> : vector<8x8xf32>
    %171 = vector.multi_reduction <add>, %170, %cst_72 [2] : vector<8x8x8xf32> to vector<8x8xf32>
    %172 = vector.shape_cast %171 : vector<8x8xf32> to vector<8x8x1xf32>
    %173 = tpu.reciprocal %172 {approx = true} : vector<8x8x1xf32> -> vector<8x8x1xf32>
    %174 = vector.broadcast %173 : vector<8x8x1xf32> to vector<8x8x8xf32>
    %175 = arith.mulf %170, %174 : vector<8x8x8xf32>
    %176 = arith.truncf %175 : vector<8x8x8xf32> to vector<8x8x8xbf16>
    %177 = arith.truncf %160 : vector<8x8x8xf32> to vector<8x8x8xbf16>
    "tpu.trace_start"() <{level = 10 : i32, message = "bqk,bkd->bqd"}> : () -> ()
    %cst_73 = arith.constant dense<0.000000e+00> : vector<8x8x8xf32>
    %178 = tpu.matmul %176, %177, %cst_73 {dimension_numbers = #tpu.dot_dimension_numbers<[2], [1], [1], [2], [0, 0, 0, 1, 1, 2], [0], [0]>} : vector<8x8x8xbf16>, vector<8x8x8xbf16>, vector<8x8x8xf32> -> vector<8x8x8xf32>
    "tpu.trace_stop"() : () -> ()
    %179 = vector.extract_strided_slice %178 {offsets = [0, 0, 0], sizes = [2, 8, 8], strides = [1, 1, 1]} : vector<8x8x8xf32> to vector<2x8x8xf32>
    %180 = vector.extract_strided_slice %178 {offsets = [2, 0, 0], sizes = [2, 8, 8], strides = [1, 1, 1]} : vector<8x8x8xf32> to vector<2x8x8xf32>
    %181 = vector.extract_strided_slice %178 {offsets = [4, 0, 0], sizes = [2, 8, 8], strides = [1, 1, 1]} : vector<8x8x8xf32> to vector<2x8x8xf32>
    %182 = vector.extract_strided_slice %178 {offsets = [6, 0, 0], sizes = [2, 8, 8], strides = [1, 1, 1]} : vector<8x8x8xf32> to vector<2x8x8xf32>
    %183 = tpu.concatenate %179, %180, %181, %182 in 2 : vector<2x8x8xf32>, vector<2x8x8xf32>, vector<2x8x8xf32>, vector<2x8x8xf32> -> vector<2x8x32xf32>
    %184 = vector.shape_cast %183 : vector<2x8x32xf32> to vector<16x32xf32>
    %c1_74 = arith.constant 1 : index
    %c0_75 = arith.constant 0 : index
    %c0_76 = arith.constant 0 : index
    %185 = vector.load %arg7[%c1_74, %c0_75, %c0_76] : memref<2x32x32xbf16, #tpu.memory_space<vmem>>, vector<1x32x32xbf16>
    %186 = vector.shape_cast %185 : vector<1x32x32xbf16> to vector<32x32xbf16>
    %187 = arith.truncf %184 : vector<16x32xf32> to vector<16x32xbf16>
    %cst_77 = arith.constant dense<0.000000e+00> : vector<16x32xf32>
    %188 = tpu.matmul %187, %186, %cst_77 {dimension_numbers = #tpu.dot_dimension_numbers<[1], [0], [0], [1], [0, 0, 1, 1], [], []>} : vector<16x32xbf16>, vector<32x32xbf16>, vector<16x32xf32> -> vector<16x32xf32>
    %c1_78 = arith.constant 1 : index
    %c0_79 = arith.constant 0 : index
    %c0_80 = arith.constant 0 : index
    %189 = vector.load %arg8[%c1_78, %c0_79, %c0_80] : memref<2x1x32xf32, #tpu.memory_space<vmem>>, vector<1x1x32xf32>
    %190 = vector.shape_cast %189 : vector<1x1x32xf32> to vector<1x32xf32>
    %191 = vector.broadcast %190 : vector<1x32xf32> to vector<16x32xf32>
    %192 = arith.addf %188, %191 : vector<16x32xf32>
    %193 = arith.addf %136, %192 : vector<16x32xf32>
    %c1_81 = arith.constant 1 : index
    %c0_82 = arith.constant 0 : index
    %c0_83 = arith.constant 0 : index
    %194 = vector.load %arg13[%c1_81, %c0_82, %c0_83] : memref<2x1x32xf32, #tpu.memory_space<vmem>>, vector<1x1x32xf32>
    %195 = vector.shape_cast %194 : vector<1x1x32xf32> to vector<1x32xf32>
    %c1_84 = arith.constant 1 : index
    %c0_85 = arith.constant 0 : index
    %c0_86 = arith.constant 0 : index
    %196 = vector.load %arg14[%c1_84, %c0_85, %c0_86] : memref<2x1x32xf32, #tpu.memory_space<vmem>>, vector<1x1x32xf32>
    %197 = vector.shape_cast %196 : vector<1x1x32xf32> to vector<1x32xf32>
    %cst_87 = arith.constant dense<0.000000e+00> : vector<16xf32>
    %198 = vector.multi_reduction <add>, %193, %cst_87 [1] : vector<16x32xf32> to vector<16xf32>
    %199 = vector.shape_cast %198 : vector<16xf32> to vector<16x1xf32>
    %cst_88 = arith.constant 3.200000e+01 : f32
    %200 = vector.broadcast %cst_88 : f32 to vector<16x1xf32>
    %201 = arith.divf %199, %200 : vector<16x1xf32>
    %202 = vector.broadcast %201 : vector<16x1xf32> to vector<16x32xf32>
    %203 = arith.subf %193, %202 : vector<16x32xf32>
    %204 = arith.mulf %203, %203 : vector<16x32xf32>
    %cst_89 = arith.constant dense<0.000000e+00> : vector<16xf32>
    %205 = vector.multi_reduction <add>, %204, %cst_89 [1] : vector<16x32xf32> to vector<16xf32>
    %206 = vector.shape_cast %205 : vector<16xf32> to vector<16x1xf32>
    %cst_90 = arith.constant 3.200000e+01 : f32
    %207 = vector.broadcast %cst_90 : f32 to vector<16x1xf32>
    %208 = arith.divf %206, %207 : vector<16x1xf32>
    %209 = vector.broadcast %201 : vector<16x1xf32> to vector<16x32xf32>
    %210 = arith.subf %193, %209 : vector<16x32xf32>
    %cst_91 = arith.constant 9.99999974E-6 : f32
    %211 = vector.broadcast %cst_91 : f32 to vector<16x1xf32>
    %212 = arith.addf %208, %211 : vector<16x1xf32>
    %213 = math.rsqrt %212 : vector<16x1xf32>
    %214 = vector.broadcast %213 : vector<16x1xf32> to vector<16x32xf32>
    %215 = arith.mulf %210, %214 : vector<16x32xf32>
    %216 = vector.broadcast %195 : vector<1x32xf32> to vector<16x32xf32>
    %217 = arith.mulf %215, %216 : vector<16x32xf32>
    %218 = vector.broadcast %197 : vector<1x32xf32> to vector<16x32xf32>
    %219 = arith.addf %217, %218 : vector<16x32xf32>
    %c1_92 = arith.constant 1 : index
    %c0_93 = arith.constant 0 : index
    %c0_94 = arith.constant 0 : index
    %220 = vector.load %arg9[%c1_92, %c0_93, %c0_94] : memref<2x32x32xbf16, #tpu.memory_space<vmem>>, vector<1x32x32xbf16>
    %221 = vector.shape_cast %220 : vector<1x32x32xbf16> to vector<32x32xbf16>
    %222 = arith.truncf %219 : vector<16x32xf32> to vector<16x32xbf16>
    %cst_95 = arith.constant dense<0.000000e+00> : vector<16x32xf32>
    %223 = tpu.matmul %222, %221, %cst_95 {dimension_numbers = #tpu.dot_dimension_numbers<[1], [0], [0], [1], [0, 0, 1, 1], [], []>} : vector<16x32xbf16>, vector<32x32xbf16>, vector<16x32xf32> -> vector<16x32xf32>
    %c1_96 = arith.constant 1 : index
    %c0_97 = arith.constant 0 : index
    %c0_98 = arith.constant 0 : index
    %224 = vector.load %arg10[%c1_96, %c0_97, %c0_98] : memref<2x1x32xf32, #tpu.memory_space<vmem>>, vector<1x1x32xf32>
    %225 = vector.shape_cast %224 : vector<1x1x32xf32> to vector<1x32xf32>
    %226 = vector.broadcast %225 : vector<1x32xf32> to vector<16x32xf32>
    %227 = arith.addf %223, %226 : vector<16x32xf32>
    %cst_99 = arith.constant 0.000000e+00 : f32
    %228 = vector.broadcast %cst_99 : f32 to vector<16x32xf32>
    %229 = arith.maximumf %227, %228 : vector<16x32xf32>
    %c1_100 = arith.constant 1 : index
    %c0_101 = arith.constant 0 : index
    %c0_102 = arith.constant 0 : index
    %230 = vector.load %arg11[%c1_100, %c0_101, %c0_102] : memref<2x32x32xbf16, #tpu.memory_space<vmem>>, vector<1x32x32xbf16>
    %231 = vector.shape_cast %230 : vector<1x32x32xbf16> to vector<32x32xbf16>
    %232 = arith.truncf %229 : vector<16x32xf32> to vector<16x32xbf16>
    %cst_103 = arith.constant dense<0.000000e+00> : vector<16x32xf32>
    %233 = tpu.matmul %232, %231, %cst_103 {dimension_numbers = #tpu.dot_dimension_numbers<[1], [0], [0], [1], [0, 0, 1, 1], [], []>} : vector<16x32xbf16>, vector<32x32xbf16>, vector<16x32xf32> -> vector<16x32xf32>
    %c1_104 = arith.constant 1 : index
    %c0_105 = arith.constant 0 : index
    %c0_106 = arith.constant 0 : index
    %234 = vector.load %arg12[%c1_104, %c0_105, %c0_106] : memref<2x1x32xf32, #tpu.memory_space<vmem>>, vector<1x1x32xf32>
    %235 = vector.shape_cast %234 : vector<1x1x32xf32> to vector<1x32xf32>
    %236 = vector.broadcast %235 : vector<1x32xf32> to vector<16x32xf32>
    %237 = arith.addf %233, %236 : vector<16x32xf32>
    %238 = arith.addf %219, %237 : vector<16x32xf32>
    %c1_107 = arith.constant 1 : index
    %c0_108 = arith.constant 0 : index
    %c0_109 = arith.constant 0 : index
    %239 = vector.load %arg15[%c1_107, %c0_108, %c0_109] : memref<2x1x32xf32, #tpu.memory_space<vmem>>, vector<1x1x32xf32>
    %240 = vector.shape_cast %239 : vector<1x1x32xf32> to vector<1x32xf32>
    %c1_110 = arith.constant 1 : index
    %c0_111 = arith.constant 0 : index
    %c0_112 = arith.constant 0 : index
    %241 = vector.load %arg16[%c1_110, %c0_111, %c0_112] : memref<2x1x32xf32, #tpu.memory_space<vmem>>, vector<1x1x32xf32>
    %242 = vector.shape_cast %241 : vector<1x1x32xf32> to vector<1x32xf32>
    %cst_113 = arith.constant dense<0.000000e+00> : vector<16xf32>
    %243 = vector.multi_reduction <add>, %238, %cst_113 [1] : vector<16x32xf32> to vector<16xf32>
    %244 = vector.shape_cast %243 : vector<16xf32> to vector<16x1xf32>
    %cst_114 = arith.constant 3.200000e+01 : f32
    %245 = vector.broadcast %cst_114 : f32 to vector<16x1xf32>
    %246 = arith.divf %244, %245 : vector<16x1xf32>
    %247 = vector.broadcast %246 : vector<16x1xf32> to vector<16x32xf32>
    %248 = arith.subf %238, %247 : vector<16x32xf32>
    %249 = arith.mulf %248, %248 : vector<16x32xf32>
    %cst_115 = arith.constant dense<0.000000e+00> : vector<16xf32>
    %250 = vector.multi_reduction <add>, %249, %cst_115 [1] : vector<16x32xf32> to vector<16xf32>
    %251 = vector.shape_cast %250 : vector<16xf32> to vector<16x1xf32>
    %cst_116 = arith.constant 3.200000e+01 : f32
    %252 = vector.broadcast %cst_116 : f32 to vector<16x1xf32>
    %253 = arith.divf %251, %252 : vector<16x1xf32>
    %254 = vector.broadcast %246 : vector<16x1xf32> to vector<16x32xf32>
    %255 = arith.subf %238, %254 : vector<16x32xf32>
    %cst_117 = arith.constant 9.99999974E-6 : f32
    %256 = vector.broadcast %cst_117 : f32 to vector<16x1xf32>
    %257 = arith.addf %253, %256 : vector<16x1xf32>
    %258 = math.rsqrt %257 : vector<16x1xf32>
    %259 = vector.broadcast %258 : vector<16x1xf32> to vector<16x32xf32>
    %260 = arith.mulf %255, %259 : vector<16x32xf32>
    %261 = vector.broadcast %240 : vector<1x32xf32> to vector<16x32xf32>
    %262 = arith.mulf %260, %261 : vector<16x32xf32>
    %263 = vector.broadcast %242 : vector<1x32xf32> to vector<16x32xf32>
    %264 = arith.addf %262, %263 : vector<16x32xf32>
    %c0_118 = arith.constant 0 : index
    %c0_119 = arith.constant 0 : index
    %265 = vector.load %arg17[%c0_118, %c0_119] : memref<16x32xf32, #tpu.memory_space<vmem>>, vector<16x32xf32>
    tpu.vector_store %arg17[%c0_118, %c0_119], %264 {strides = array<i32>} : memref<16x32xf32, #tpu.memory_space<vmem>>, vector<16x32xf32>,
    return
  }
  func.func @transform_0(%arg0: i32) -> (i32, i32) {
    %c0_i32 = arith.constant 0 : i32
    %c0_i32_0 = arith.constant 0 : i32
    return %arg0, %c0_i32 : i32, i32
  }
  func.func @transform_1(%arg0: i32) -> (i32, i32) {
    %c0_i32 = arith.constant 0 : i32
    %c0_i32_0 = arith.constant 0 : i32
    %c0_i32_1 = arith.constant 0 : i32
    return %c0_i32, %c0_i32_0 : i32, i32
  }
  func.func @transform_2(%arg0: i32) -> (i32, i32) {
    %c0_i32 = arith.constant 0 : i32
    %c0_i32_0 = arith.constant 0 : i32
    %c0_i32_1 = arith.constant 0 : i32
    return %c0_i32, %c0_i32_0 : i32, i32
  }
  func.func @transform_3(%arg0: i32) -> (i32, i32) {
    %c0_i32 = arith.constant 0 : i32
    %c0_i32_0 = arith.constant 0 : i32
    %c0_i32_1 = arith.constant 0 : i32
    return %c0_i32, %c0_i32_0 : i32, i32
  }
  func.func @transform_4(%arg0: i32) -> (i32, i32, i32) {
    %c0_i32 = arith.constant 0 : i32
    %c0_i32_0 = arith.constant 0 : i32
    %c0_i32_1 = arith.constant 0 : i32
    %c0_i32_2 = arith.constant 0 : i32
    return %c0_i32, %c0_i32_0, %c0_i32_1 : i32, i32, i32
  }
  func.func @transform_5(%arg0: i32) -> (i32, i32, i32) {
    %c0_i32 = arith.constant 0 : i32
    %c0_i32_0 = arith.constant 0 : i32
    %c0_i32_1 = arith.constant 0 : i32
    %c0_i32_2 = arith.constant 0 : i32
    return %c0_i32, %c0_i32_0, %c0_i32_1 : i32, i32, i32
  }
  func.func @transform_6(%arg0: i32) -> (i32, i32, i32) {
    %c0_i32 = arith.constant 0 : i32
    %c0_i32_0 = arith.constant 0 : i32
    %c0_i32_1 = arith.constant 0 : i32
    %c0_i32_2 = arith.constant 0 : i32
    return %c0_i32, %c0_i32_0, %c0_i32_1 : i32, i32, i32
  }
  func.func @transform_7(%arg0: i32) -> (i32, i32, i32) {
    %c0_i32 = arith.constant 0 : i32
    %c0_i32_0 = arith.constant 0 : i32
    %c0_i32_1 = arith.constant 0 : i32
    %c0_i32_2 = arith.constant 0 : i32
    return %c0_i32, %c0_i32_0, %c0_i32_1 : i32, i32, i32
  }
  func.func @transform_8(%arg0: i32) -> (i32, i32, i32) {
    %c0_i32 = arith.constant 0 : i32
    %c0_i32_0 = arith.constant 0 : i32
    %c0_i32_1 = arith.constant 0 : i32
    %c0_i32_2 = arith.constant 0 : i32
    return %c0_i32, %c0_i32_0, %c0_i32_1 : i32, i32, i32
  }
  func.func @transform_9(%arg0: i32) -> (i32, i32, i32) {
    %c0_i32 = arith.constant 0 : i32
    %c0_i32_0 = arith.constant 0 : i32
    %c0_i32_1 = arith.constant 0 : i32
    %c0_i32_2 = arith.constant 0 : i32
    return %c0_i32, %c0_i32_0, %c0_i32_1 : i32, i32, i32
  }
  func.func @transform_10(%arg0: i32) -> (i32, i32, i32) {
    %c0_i32 = arith.constant 0 : i32
    %c0_i32_0 = arith.constant 0 : i32
    %c0_i32_1 = arith.constant 0 : i32
    %c0_i32_2 = arith.constant 0 : i32
    return %c0_i32, %c0_i32_0, %c0_i32_1 : i32, i32, i32
  }
  func.func @transform_11(%arg0: i32) -> (i32, i32, i32) {
    %c0_i32 = arith.constant 0 : i32
    %c0_i32_0 = arith.constant 0 : i32
    %c0_i32_1 = arith.constant 0 : i32
    %c0_i32_2 = arith.constant 0 : i32
    return %c0_i32, %c0_i32_0, %c0_i32_1 : i32, i32, i32
  }
  func.func @transform_12(%arg0: i32) -> (i32, i32, i32) {
    %c0_i32 = arith.constant 0 : i32
    %c0_i32_0 = arith.constant 0 : i32
    %c0_i32_1 = arith.constant 0 : i32
    %c0_i32_2 = arith.constant 0 : i32
    return %c0_i32, %c0_i32_0, %c0_i32_1 : i32, i32, i32
  }
  func.func @transform_13(%arg0: i32) -> (i32, i32, i32) {
    %c0_i32 = arith.constant 0 : i32
    %c0_i32_0 = arith.constant 0 : i32
    %c0_i32_1 = arith.constant 0 : i32
    %c0_i32_2 = arith.constant 0 : i32
    return %c0_i32, %c0_i32_0, %c0_i32_1 : i32, i32, i32
  }
  func.func @transform_14(%arg0: i32) -> (i32, i32, i32) {
    %c0_i32 = arith.constant 0 : i32
    %c0_i32_0 = arith.constant 0 : i32
    %c0_i32_1 = arith.constant 0 : i32
    %c0_i32_2 = arith.constant 0 : i32
    return %c0_i32, %c0_i32_0, %c0_i32_1 : i32, i32, i32
  }
  func.func @transform_15(%arg0: i32) -> (i32, i32, i32) {
    %c0_i32 = arith.constant 0 : i32
    %c0_i32_0 = arith.constant 0 : i32
    %c0_i32_1 = arith.constant 0 : i32
    %c0_i32_2 = arith.constant 0 : i32
    return %c0_i32, %c0_i32_0, %c0_i32_1 : i32, i32, i32
  }
  func.func @transform_16(%arg0: i32) -> (i32, i32) {
    %c0_i32 = arith.constant 0 : i32
    %c0_i32_0 = arith.constant 0 : i32
    return %arg0, %c0_i32 : i32, i32
  }
}

</mosaic_0001>

<bundles_post_ra>
// kernel: tpu_custom_call.1
= control target key start
LH: loop header
LB: loop body
LE: loop exit
PB: predicated region body
PF: predicated region fallthrough
CT: control target
= control target key end

     0   :  { %s2732_s0 = inlined_call_operand.vmem [shape: f32[16,4], index: 0, kind: input, shape index: {}]   ;;  %s2733_s1 = inlined_call_operand.vmem [shape: f32[16,32], index: 1, kind: input, shape index: {}]   ;;  %s2734_s2 = inlined_call_operand.vmem [shape: bf16[4,32], index: 2, kind: input, shape index: {}]   ;;  %s2735_s3 = inlined_call_operand.hbm [shape: f32[1,32], index: 3, kind: input, shape index: {}]   ;;  %s2736_s4 = inlined_call_operand.hbm [shape: bf16[2,32,96], index: 4, kind: input, shape index: {}]   ;;  %s2737_s5 = inlined_call_operand.vmem [shape: f32[2,1,96], index: 5, kind: input, shape index: {}]   ;;  %s2738_s6 = inlined_call_operand.hbm [shape: bf16[2,32,32], index: 6, kind: input, shape index: {}]   ;;  %s2739_s7 = inlined_call_operand.vmem [shape: f32[2,1,32], index: 7, kind: input, shape index: {}]   ;;  %s2740_s8 = inlined_call_operand.hbm [shape: bf16[2,32,32], index: 8, kind: input, shape index: {}]   ;;  %s2741_s9 = inlined_call_operand.vmem [shape: f32[2,1,32], index: 9, kind: input, shape index: {}]   ;;  %s2742_s10 = inlined_call_operand.hbm [shape: bf16[2,32,32], index: 10, kind: input, shape index: {}]   ;;  %s2743_s11 = inlined_call_operand.vmem [shape: f32[2,1,32], index: 11, kind: input, shape index: {}]   ;;  %s2744_s12 = inlined_call_operand.vmem [shape: f32[2,1,32], index: 12, kind: input, shape index: {}]   ;;  %s2745_s13 = inlined_call_operand.vmem [shape: f32[2,1,32], index: 13, kind: input, shape index: {}]   ;;  %s2746_s14 = inlined_call_operand.vmem [shape: f32[2,1,32], index: 14, kind: input, shape index: {}]   ;;  %s2747_s15 = inlined_call_operand.vmem [shape: f32[2,1,32], index: 15, kind: input, shape index: {}]   ;;  %s2748_s16 = inlined_call_operand.hbm [shape: f32[16,32], index: 16, kind: output, shape index: {}]  }
   0x1   :  { %2750 = sst [smem:[#allocation16_spill]] %s2732_s0 }
   0x2   :  { %21 = vsyncpa [#allocation3], 0 }
   0x3   :  { %22 = vsyncpa [#allocation6], 0 }
   0x4   :  { %23 = vsyncpa [#allocation9], 0  ;;  %s46_s23 = sshll.u32 %s2736_s4, 4  ;;  %s47_s23 = int_to_ptr.hbm [resolvable:$true] %s46_s23 }
   0x5   :  { %24 = vsyncpa [#allocation4], 0  ;;  %s2253_s24 = smov [#allocation5]   ;;  %s76_s28 = sshll.u32 %s2740_s8, 4  ;;  %s77_s28 = int_to_ptr.hbm [resolvable:$true] %s76_s28 }
   0x6   :  { %s48_s25 = sshll.u32 %s2253_s24, 4  ;;  %s2254_s29 = smov 64   ;;  %s49_s25 = int_to_ptr.vmem [resolvable:$true] %s48_s25 }
   0x7   :  { %s2255_s30 = smov 4   ;;  %s2256_s0 = smov [#allocation8]  }
   0x8   :  { %54 = dma.hbm_to_vmem [thread:$0]  %s47_s23, 512, %s49_s25, [#allocation6], %s2254_s29, %s2254_s29, %s2255_s30  }
   0x9   :  { %s78_s17 = sshll.u32 %s2256_s0, 4  ;;  %s36_s4 = sshll.u32 %s2735_s3, 4  ;;  %s79_s17 = int_to_ptr.vmem [resolvable:$true] %s78_s17  ;;  %s37_s4 = int_to_ptr.hbm [resolvable:$true] %s36_s4 }
   0xa   :  { %84 = dma.hbm_to_vmem [thread:$0]  %s77_s28, 512, %s79_s17, [#allocation9], %s2254_s29, %s2254_s29, %s2255_s30  }
   0xb   :  { %s61_s8 = sshll.u32 %s2738_s6, 4  ;;  %s2257_s22 = smov [#allocation2]   ;;  %s62_s8 = int_to_ptr.hbm [resolvable:$true] %s61_s8 }
   0xc   :  { %s38_s24 = sshll.u32 %s2257_s22, 4  ;;  %s2258_s23 = smov [#allocation7]   ;;  %s39_s24 = int_to_ptr.vmem [resolvable:$true] %s38_s24 }
   0xd   :  { %41 = dma.hbm_to_vmem [thread:$0]  %s37_s4, 16, %s39_s24, [#allocation3]  }
   0xe   :  { %s63_s25 = sshll.u32 %s2258_s23, 4  ;;  %s91_s3 = sshll.u32 %s2742_s10, 4  ;;  %s64_s25 = int_to_ptr.vmem [resolvable:$true] %s63_s25  ;;  %s92_s3 = int_to_ptr.hbm [resolvable:$true] %s91_s3 }
   0xf   :  { %69 = dma.hbm_to_vmem [thread:$0]  %s62_s8, 512, %s64_s25, [#allocation6], %s2254_s29, %s2254_s29, %s2255_s30  }
  0x10   :  { %s2259_s28 = smov [#allocation10]  }
  0x11   :  { %s93_s0 = sshll.u32 %s2259_s28, 4  ;;  %s94_s0 = int_to_ptr.vmem [resolvable:$true] %s93_s0 }
  0x12   :  { %99 = dma.hbm_to_vmem [thread:$0]  %s92_s3, 512, %s94_s0, [#allocation9], %s2254_s29, %s2254_s29, %s2255_s30  }
  0x13   :  { %2245 = dma.done.wait [#allocation3], 16  }
  0x14   :  { %2246 = vsyncadd [#allocation3], 4294967280 }
  0x15   :  { %2247 = dma.done.wait [#allocation6], 1024  }
  0x16   :  { %2248 = vsyncadd [#allocation6], 4294966272 }
  0x17   :  { %2249 = dma.done.wait [#allocation9], 1024  }
  0x18   :  { %2250 = vsyncadd [#allocation9], 4294966272  ;;  %vm143_vm0 = vcmask 1041408   ;;  %v133_v0 = vld [vmem:[%s2734_s2] sm:$0x3]  ;;  %s2751_s19 = sld [smem:[#allocation16_spill]] }
  0x19   :  { %v145_v3 = vsel %vm143_vm0, %v133_v0, 0  ;;  %vm139_vm1 = vcmask 31744   ;;  %v1910_v5 = vld [vmem:[#allocation5 + $0x8] sm:$0xff]  ;;  %v1909_v6 = vld [vmem:[#allocation5] sm:$0xff]  ;;  %v2002_v8 = vld [vmem:[#allocation2] ss:$0 sm:$0xff] }
  0x1a   :  { %154 = vmatpush.bf16.msra.mxu0 %v145_v3  ;;  %196 = vmatpush.bf16.msra.mxu1 %v1910_v5  ;;  %v161_v10 = vld [vmem:[%s2733_s1] sm:$0xff]  ;;  %v162_v12 = vld [vmem:[%s2733_s1 + $0x8] sm:$0xff]  ;;  %vm186_vm2 = vcmask 261120   ;;  %s2260_s1 = smov 104   ;;  %s2261_s23 = smov 120   ;;  %vm237_vm3 = vcmask 64512  }
  0x1b   :  { %v2003_v18 = vld [vmem:[%s2737_s5] ss:$0 sm:$0xff]  ;;  %s2262_s25 = smov 96   ;;  %s2263_s26 = smov 112   ;;  %vm534_vm4 = vcmask 1043456   ;;  %vm724_vm5 = vcmask 130048  }
  0x1c   :  { %s2264_s27 = smov 8   ;;  %s2265_s3 = smov 24   ;;  %vm727_vm6 = vcmask 195584  }
  0x1d   :  { %s2266_s28 = smov 16   ;;  %s1781_s4 = sshll.u32 %s2748_s16, 4  ;;  %s1782_s4 = int_to_ptr.hbm [resolvable:$true] %s1781_s4 }
  0x1e   :  { %v131_v1 = vld [vmem:[%s2751_s19] sm:$0xff]  ;;  %v132_v2 = vld [vmem:[%s2751_s19 + $0x8] sm:$0xff]  ;;  %197 = vmatpush.bf16.msra.mxu1 %v1909_v6 }
  0x1f   :  { %v134_v4 = vpack.c.bf16 %v132_v2, %v131_v1 }
  0x21   :  { %1796 = vmatmul.msk.bf16.vlgmr.msra.gmra.mxu0 %vm139_vm1, %v134_v4 }
  0x9e   :  { %v156_v7 = vpop.f32.mrf.mxu0 }
  0x9f   :  { %v157_v9 = vadd.f32 %v2002_v8, %v156_v7 }
  0xa1   :  { %v2393_v14 = vadd.f32 %v161_v10, %v157_v9 }
  0xa6   :  { %v158_v11 = vpop.f32.mrf.mxu0 }
  0xa7   :  { %v159_v13 = vadd.f32 %v2002_v8, %v158_v11 }
  0xa9   :  { %v2395_v15 = vadd.f32 %v162_v12, %v159_v13 }
  0xab   :  { %v169_v16 = vpack.c.bf16 %v2395_v15, %v2393_v14 }
  0xad   :  { %1805 = vmatmul.msk.bf16.vlgmr.msra.gmra.mxu1 %vm186_vm2, %v169_v16 }
 0x12a   :  { %v199_v17 = vpop.f32.mrf.mxu1 }
 0x12b   :  { %v200_v19 = vadd.f32 %v2003_v18, %v199_v17 }
 0x12d   :  { %v224_v24 = vpack.c.bf16 %v200_v19, %v200_v19 }
 0x12f   :  { %v233_v27 = vunpack.c.l.b16 %v224_v24 }
 0x131   :  { %v234_v28 = vpack.c.b16 %v233_v27, %v233_v27 }
 0x132   :  { %v201_v20 = vpop.f32.mrf.mxu1 }
 0x133   :  { %v202_v21 = vadd.f32 %v2003_v18, %v201_v20 }
 0x135   :  { %v1952_v22 = vpack.i.bf16 %v202_v21, %v200_v19  ;;  %v225_v23 = vpack.c.bf16 %v202_v21, %v202_v21 }
 0x137   :  { %1953 = vrot.lane.b32.xlu1 %v1952_v22, %s2260_s1  ;;  %1943 = vrot.lane.b32.xlu0 %v1952_v22, %s2261_s23  ;;  %v258_v25 = vunpack.c.l.b16 %v225_v23 }
 0x139   :  { %v259_v26 = vpack.c.b16 %v258_v25, %v258_v25 }
 0x13b   :  { %260 = vrot.lane.b32.xlu2 %v259_v26, %s2262_s25 }
 0x13f   :  { %1948 = vrot.lane.b32.xlu0 %v1952_v22, %s2263_s26  ;;  %235 = vrot.lane.b32.xlu1 %v234_v28, %s2262_s25 }
 0x195   :  { %v261_v29 = vpop.permute.xlu2 %260 }
 0x196   :  { %v266_v30 = vsel %vm237_vm3, %v261_v29, 0 }
 0x197   :  { %275 = vmatpush.bf16.xpose.msra.mxu3 %v266_v30 }
 0x19e   :  { %1807 = vmatmul.msk.bf16.vlgmr.msra.gmra.mxu3 %vm237_vm3, %v225_v23 }
 0x1a9   :  { %v1954_v31 = vpop.permute.xlu1 %1953  ;;  %v1944_v32 = vpop.permute.xlu0 %1943 }
 0x1aa   :  { %v1946_v33 = vunpack.i.h.bf16 %v1944_v32  ;;  %v1945_v34 = vunpack.i.l.bf16 %v1944_v32  ;;  %v1955_v35 = vunpack.i.l.bf16 %v1954_v31  ;;  %v1956_v51 = vunpack.i.h.bf16 %v1954_v31 }
 0x1ac   :  { %v227_v36 = vpack.c.bf16 %v1946_v33, %v1946_v33  ;;  %v226_v37 = vpack.c.bf16 %v1945_v34, %v1945_v34  ;;  %v230_v40 = vpack.c.bf16 %v1955_v35, %v1955_v35  ;;  %v231_v57 = vpack.c.bf16 %v1956_v51, %v1956_v51 }
 0x1ae   :  { %v306_v38 = vunpack.c.l.b16 %v227_v36  ;;  %v282_v39 = vunpack.c.l.b16 %v226_v37  ;;  %v378_v48 = vunpack.c.l.b16 %v230_v40  ;;  %v402_v58 = vunpack.c.l.b16 %v231_v57 }
 0x1b0   :  { %v2410_v41 = vpack.c.b16 %v306_v38, %v306_v38  ;;  %v283_v42 = vpack.c.b16 %v282_v39, %v282_v39  ;;  %v2416_v54 = vpack.c.b16 %v378_v48, %v378_v48  ;;  %v2429_v59 = vpack.c.b16 %v402_v58, %v402_v58 }
 0x1b1   :  { %v1949_v43 = vpop.permute.xlu0 %1948  ;;  %v236_v44 = vpop.permute.xlu1 %235 }
 0x1b2   :  { %v1951_v45 = vunpack.i.h.bf16 %v1949_v43  ;;  %v1950_v46 = vunpack.i.l.bf16 %v1949_v43  ;;  %308 = vrot.lane.b32.xlu0 %v2410_v41, %s2262_s25  ;;  %284 = vrot.lane.b32.xlu2 %v283_v42, %s2262_s25  ;;  %v242_v47 = vsel %vm237_vm3, %v236_v44, 0 }
 0x1b3   :  { %251 = vmatpush.bf16.xpose.msra.mxu2 %v242_v47 }
 0x1b4   :  { %v229_v49 = vpack.c.bf16 %v1951_v45, %v1951_v45  ;;  %v228_v50 = vpack.c.bf16 %v1950_v46, %v1950_v46 }
 0x1b6   :  { %v354_v52 = vunpack.c.l.b16 %v229_v49  ;;  %v330_v53 = vunpack.c.l.b16 %v228_v50 }
 0x1b8   :  { %v2418_v55 = vpack.c.b16 %v354_v52, %v354_v52  ;;  %v2420_v56 = vpack.c.b16 %v330_v53, %v330_v53 }
 0x1ba   :  { %380 = vrot.lane.b32.xlu0 %v2416_v54, %s2262_s25  ;;  %356 = vrot.lane.b32.xlu2 %v2418_v55, %s2262_s25 }
 0x1bb   :  { %332 = vrot.lane.b32.xlu1 %v2420_v56, %s2262_s25  ;;  %1806 = vmatmul.msk.bf16.vlgmr.msra.gmra.mxu2 %vm237_vm3, %v224_v24 }
 0x1c2   :  { %551 = vrot.lane.b32.xlu2 %v259_v26, %s2254_s29 }
 0x1c3   :  { %404 = vrot.lane.b32.xlu1 %v2429_v59, %s2262_s25 }
 0x1cb   :  { %529 = vrot.lane.b32.xlu1 %v234_v28, %s2254_s29 }
 0x20c   :  { %v285_v60 = vpop.permute.xlu2 %284 }
 0x20d   :  { %v290_v61 = vsel %vm237_vm3, %v285_v60, 0 }
 0x20e   :  { %299 = vmatpush.bf16.xpose.msrb.mxu0 %v290_v61 }
 0x214   :  { %v357_v62 = vpop.permute.xlu2 %356 }
 0x215   :  { %1808 = vmatmul.msk.bf16.vlgmr.msrb.gmra.mxu0 %vm237_vm3, %v226_v37  ;;  %v362_v63 = vsel %vm237_vm3, %v357_v62, 0 }
 0x216   :  { %371 = vmatpush.bf16.xpose.msrb.mxu3 %v362_v63 }
 0x21c   :  { %v552_v0 = vpop.permute.xlu2 %551 }
 0x21d   :  { %v557_v1 = vsel %vm534_vm4, %v552_v0, 0  ;;  %1811 = vmatmul.msk.bf16.vlgmr.msrb.gmra.mxu3 %vm237_vm3, %v229_v49 }
 0x21e   :  { %566 = vmatpush.bf16.msra.mxu3 %v557_v1 }
 0x221   :  { %v277_v2 = vpop.f32.mrf.mxu3 }
 0x222   :  { %v2440_v3 = vmul.f32 0.35355338, %v277_v2 }
 0x224   :  { %v309_v4 = vpop.permute.xlu0 %308  ;;  %v436_v5 = vsel %vm237_vm3, %v2440_v3, -inf }
 0x225   :  { %437 = vmax.xlane.f32.xlu0 %v436_v5  ;;  %v314_v6 = vsel %vm237_vm3, %v309_v4, 0 }
 0x226   :  { %323 = vmatpush.bf16.xpose.msrb.mxu1 %v314_v6 }
 0x229   :  { %v279_v7 = vpop.f32.mrf.mxu3 }
 0x22c   :  { %v381_v8 = vpop.permute.xlu0 %380 }
 0x22d   :  { %v386_v9 = vsel %vm237_vm3, %v381_v8, 0  ;;  %v333_v10 = vpop.permute.xlu1 %332  ;;  %1809 = vmatmul.msk.bf16.vlgmr.msrb.gmra.mxu1 %vm237_vm3, %v227_v36 }
 0x22e   :  { %v338_v11 = vsel %vm237_vm3, %v333_v10, 0  ;;  %395 = vmatpush.bf16.xpose.msra.mxu0 %v386_v9 }
 0x22f   :  { %347 = vmatpush.bf16.xpose.msrb.mxu2 %v338_v11 }
 0x235   :  { %v405_v12 = vpop.permute.xlu1 %404  ;;  %1812 = vmatmul.msk.bf16.vlgmr.msra.gmra.mxu0 %vm237_vm3, %v230_v40 }
 0x236   :  { %v410_v13 = vsel %vm237_vm3, %v405_v12, 0  ;;  %1810 = vmatmul.msk.bf16.vlgmr.msrb.gmra.mxu2 %vm237_vm3, %v228_v50 }
 0x237   :  { %419 = vmatpush.bf16.xpose.msra.mxu1 %v410_v13 }
 0x239   :  { %572 = vrot.lane.b32.xlu0 %v283_v42, %s2254_s29 }
 0x23d   :  { %v530_v16 = vpop.permute.xlu1 %529 }
 0x23e   :  { %v536_v17 = vsel %vm534_vm4, %v530_v16, 0  ;;  %v253_v18 = vpop.f32.mrf.mxu2  ;;  %1813 = vmatmul.msk.bf16.vlgmr.msra.gmra.mxu1 %vm237_vm3, %v231_v57 }
 0x23f   :  { %v425_v19 = vmul.f32 0.35355338, %v253_v18  ;;  %545 = vmatpush.bf16.msra.mxu2 %v536_v17 }
 0x241   :  { %v433_v20 = vsel %vm237_vm3, %v425_v19, -inf }
 0x242   :  { %434 = vmax.xlane.f32.xlu2 %v433_v20 }
 0x246   :  { %v255_v21 = vpop.f32.mrf.mxu2 }
 0x292   :  { %v301_v22 = vpop.f32.mrf.mxu0 }
 0x293   :  { %v427_v23 = vmul.f32 0.35355338, %v301_v22 }
 0x295   :  { %v439_v24 = vsel %vm237_vm3, %v427_v23, -inf }
 0x296   :  { %440 = vmax.xlane.f32.xlu1 %v439_v24 }
 0x298   :  { %v438_v28 = vpop.xlane.xlu0 %437 }
 0x299   :  { %v458_v52 = vsub.f32 %v2440_v3, %v438_v28 }
 0x29a   :  { %v303_v25 = vpop.f32.mrf.mxu0 }
 0x29b   :  { %v467_v53 = vmul.f32 1.442695, %v458_v52 }
 0x2a0   :  { %v373_v26 = vpop.f32.mrf.mxu3 }
 0x2a1   :  { %v430_v27 = vmul.f32 0.35355338, %v373_v26 }
 0x2a3   :  { %v448_v29 = vsel %vm237_vm3, %v430_v27, -inf }
 0x2a4   :  { %449 = vmax.xlane.f32.xlu0 %v448_v29 }
 0x2a8   :  { %v375_v30 = vpop.f32.mrf.mxu3 }
 0x2aa   :  { %v325_v31 = vpop.f32.mrf.mxu1 }
 0x2ab   :  { %v573_v32 = vpop.permute.xlu0 %572  ;;  %v428_v46 = vmul.f32 0.35355338, %v325_v31 }
 0x2ac   :  { %v578_v33 = vsel %vm534_vm4, %v573_v32, 0 }
 0x2ad   :  { %587 = vmatpush.bf16.msrb.mxu0 %v578_v33  ;;  %v442_v49 = vsel %vm237_vm3, %v428_v46, -inf }
 0x2af   :  { %593 = vrot.lane.b32.xlu1 %v2410_v41, %s2254_s29 }
 0x2b2   :  { %v327_v34 = vpop.f32.mrf.mxu1  ;;  %v397_v35 = vpop.f32.mrf.mxu0 }
 0x2b3   :  { %v431_v57 = vmul.f32 0.35355338, %v397_v35 }
 0x2b5   :  { %v435_v36 = vpop.xlane.xlu2 %434  ;;  %v451_v58 = vsel %vm237_vm3, %v431_v57, -inf }
 0x2b6   :  { %v457_v37 = vsub.f32 %v425_v19, %v435_v36 }
 0x2b8   :  { %v465_v38 = vmul.f32 1.442695, %v457_v37 }
 0x2b9   :  { %v349_v39 = vpop.f32.mrf.mxu2 }
 0x2ba   :  { %2019 = vpow2.f32 %v465_v38  ;;  %v429_v40 = vmul.f32 0.35355338, %v349_v39  ;;  %v399_v42 = vpop.f32.mrf.mxu0 }
 0x2bb   :  { %v421_v43 = vpop.f32.mrf.mxu1  ;;  %2021 = vpow2.f32 %v467_v53 }
 0x2bc   :  { %v445_v44 = vsel %vm237_vm3, %v429_v40, -inf  ;;  %v432_v50 = vmul.f32 0.35355338, %v421_v43 }
 0x2bd   :  { %446 = vmax.xlane.f32.xlu2 %v445_v44 }
 0x2be   :  { %v454_v51 = vsel %vm237_vm3, %v432_v50, -inf }
 0x2c0   :  { %v2020_v45 = vpop.eup %2019 }
 0x2c1   :  { %v351_v47 = vpop.f32.mrf.mxu2  ;;  %v481_v48 = vsel %vm237_vm3, %v2020_v45, 0.0  ;;  %v2022_v60 = vpop.eup %2021 }
 0x2c2   :  { %482 = vadd.xlane.f32.xlu0 %v481_v48  ;;  %v484_v61 = vsel %vm237_vm3, %v2022_v60, 0.0 }
 0x2c3   :  { %v423_v41 = vpop.f32.mrf.mxu1 }
 0x2c5   :  { %443 = vmax.xlane.f32.xlu2 %v442_v49 }
 0x2cd   :  { %455 = vmax.xlane.f32.xlu2 %v454_v51 }
 0x2d9   :  { %452 = vmax.xlane.f32.xlu1 %v451_v58 }
 0x2e1   :  { %485 = vadd.xlane.f32.xlu1 %v484_v61 }
 0x2e5   :  { %614 = vrot.lane.b32.xlu2 %v2420_v56, %s2254_s29 }
 0x309   :  { %v441_v62 = vpop.xlane.xlu1 %440 }
 0x30a   :  { %v459_v63 = vsub.f32 %v427_v23, %v441_v62 }
 0x30c   :  { %v469_v0 = vmul.f32 1.442695, %v459_v63 }
 0x30e   :  { %2023 = vpow2.f32 %v469_v0 }
 0x314   :  { %v2024_v1 = vpop.eup %2023 }
 0x315   :  { %v487_v2 = vsel %vm237_vm3, %v2024_v1, 0.0 }
 0x316   :  { %488 = vadd.xlane.f32.xlu2 %v487_v2 }
 0x317   :  { %v450_v3 = vpop.xlane.xlu0 %449 }
 0x318   :  { %v462_v4 = vsub.f32 %v430_v27, %v450_v3 }
 0x31a   :  { %v475_v5 = vmul.f32 1.442695, %v462_v4 }
 0x31c   :  { %2025 = vpow2.f32 %v475_v5 }
 0x321   :  { %v594_v6 = vpop.permute.xlu1 %593 }
 0x322   :  { %v2470_v7 = vpop.eup %2025  ;;  %v599_v8 = vsel %vm534_vm4, %v594_v6, 0 }
 0x323   :  { %608 = vmatpush.bf16.msrb.mxu1 %v599_v8  ;;  %v496_v56 = vsel %vm237_vm3, %v2470_v7, 0.0 }
 0x324   :  { %497 = vadd.xlane.f32.xlu2 %v496_v56 }
 0x330   :  { %v447_v9 = vpop.xlane.xlu2 %446 }
 0x331   :  { %v461_v10 = vsub.f32 %v429_v40, %v447_v9 }
 0x333   :  { %v473_v11 = vmul.f32 1.442695, %v461_v10 }
 0x335   :  { %2027 = vpow2.f32 %v473_v11  ;;  %v483_v12 = vpop.xlane.xlu0 %482 }
 0x336   :  { %2029 = vrcp.f32 %v483_v12 }
 0x338   :  { %v444_v13 = vpop.xlane.xlu2 %443 }
 0x339   :  { %v460_v16 = vsub.f32 %v428_v46, %v444_v13 }
 0x33b   :  { %v2028_v17 = vpop.eup %2027  ;;  %v471_v18 = vmul.f32 1.442695, %v460_v16 }
 0x33c   :  { %v2030_v19 = vpop.eup %2029  ;;  %v493_v20 = vsel %vm237_vm3, %v2028_v17, 0.0  ;;  %677 = vrot.lane.b32.xlu2 %v2429_v59, %s2254_s29 }
 0x33d   :  { %v513_v21 = vmul.f32 %v2030_v19, %v2020_v45  ;;  %2031 = vpow2.f32 %v471_v18  ;;  %494 = vadd.xlane.f32.xlu0 %v493_v20 }
 0x33f   :  { %v521_v22 = vpack.c.bf16 %v513_v21, %v513_v21 }
 0x340   :  { %v456_v23 = vpop.xlane.xlu2 %455 }
 0x341   :  { %v464_v24 = vsub.f32 %v432_v50, %v456_v23  ;;  %1814 = vmatmul.msk.bf16.vlgmr.msra.gmra.mxu2 %vm237_vm3, %v521_v22 }
 0x343   :  { %v2032_v25 = vpop.eup %2031  ;;  %v479_v26 = vmul.f32 1.442695, %v464_v24 }
 0x344   :  { %v490_v27 = vsel %vm237_vm3, %v2032_v25, 0.0 }
 0x345   :  { %2033 = vpow2.f32 %v479_v26  ;;  %491 = vadd.xlane.f32.xlu0 %v490_v27 }
 0x348   :  { %v615_v28 = vpop.permute.xlu2 %614 }
 0x349   :  { %v620_v29 = vsel %vm534_vm4, %v615_v28, 0  ;;  %v1912_v28 = vld [vmem:[#allocation7 + $0x8] sm:$0xff] }
 0x34a   :  { %629 = vmatpush.bf16.msrb.mxu2 %v620_v29  ;;  %v1911_v29 = vld [vmem:[#allocation7] sm:$0xff] }
 0x34b   :  { %v2034_v30 = vpop.eup %2033 }
 0x34c   :  { %v502_v59 = vsel %vm237_vm3, %v2034_v30, 0.0  ;;  %v453_v31 = vpop.xlane.xlu1 %452 }
 0x34d   :  { %503 = vadd.xlane.f32.xlu0 %v502_v59  ;;  %v463_v32 = vsub.f32 %v431_v57, %v453_v31 }
 0x34e   :  { %760 = vmatpush.bf16.msra.mxu2 %v1912_v28  ;;  %v2005_v28 = vld [vmem:[%s2744_s12] ss:$0 sm:$0xff] }
 0x34f   :  { %v477_v33 = vmul.f32 1.442695, %v463_v32 }
 0x351   :  { %2035 = vpow2.f32 %v477_v33 }
 0x352   :  { %761 = vmatpush.bf16.msra.mxu2 %v1911_v29 }
 0x354   :  { %v486_v34 = vpop.xlane.xlu1 %485 }
 0x355   :  { %2037 = vrcp.f32 %v486_v34 }
 0x357   :  { %v2036_v35 = vpop.eup %2035 }
 0x358   :  { %v499_v36 = vsel %vm237_vm3, %v2036_v35, 0.0 }
 0x359   :  { %500 = vadd.xlane.f32.xlu1 %v499_v36 }
 0x35b   :  { %v2038_v37 = vpop.eup %2037 }
 0x35c   :  { %v514_v38 = vmul.f32 %v2038_v37, %v2022_v60 }
 0x35e   :  { %v522_v39 = vpack.c.bf16 %v514_v38, %v514_v38 }
 0x360   :  { %1815 = vmatmul.msk.bf16.vlgmr.msra.gmra.mxu3 %vm237_vm3, %v522_v39 }
 0x361   :  { %656 = vrot.lane.b32.xlu0 %v2416_v54, %s2254_s29 }
 0x372   :  { %635 = vrot.lane.b32.xlu1 %v2418_v55, %s2254_s29 }
 0x389   :  { %v489_v40 = vpop.xlane.xlu2 %488 }
 0x38a   :  { %2039 = vrcp.f32 %v489_v40 }
 0x390   :  { %v2040_v42 = vpop.eup %2039 }
 0x391   :  { %v515_v43 = vmul.f32 %v2040_v42, %v2024_v1 }
 0x393   :  { %v523_v44 = vpack.c.bf16 %v515_v43, %v515_v43 }
 0x395   :  { %1816 = vmatmul.msk.bf16.vlgmr.msrb.gmra.mxu0 %vm237_vm3, %v523_v44 }
 0x397   :  { %v498_v45 = vpop.xlane.xlu2 %497 }
 0x39f   :  { %v678_v46 = vpop.permute.xlu2 %677 }
 0x3a0   :  { %v683_v47 = vsel %vm534_vm4, %v678_v46, 0  ;;  %v2004_v46 = vld [vmem:[%s2739_s7] ss:$0 sm:$0xff] }
 0x3a1   :  { %692 = vmatpush.bf16.msra.mxu1 %v683_v47 }
 0x3b0   :  { %v495_v48 = vpop.xlane.xlu0 %494 }
 0x3b1   :  { %2041 = vrcp.f32 %v495_v48 }
 0x3b7   :  { %v2042_v41 = vpop.eup %2041 }
 0x3b8   :  { %v517_v49 = vmul.f32 %v2042_v41, %v2028_v17  ;;  %v492_v54 = vpop.xlane.xlu0 %491 }
 0x3b9   :  { %2043 = vrcp.f32 %v492_v54 }
 0x3ba   :  { %v525_v50 = vpack.c.bf16 %v517_v49, %v517_v49 }
 0x3bc   :  { %1818 = vmatmul.msk.bf16.vlgmr.msrb.gmra.mxu2 %vm237_vm3, %v525_v50 }
 0x3bf   :  { %v2044_v55 = vpop.eup %2043 }
 0x3c0   :  { %v516_v51 = vmul.f32 %v2044_v55, %v2032_v25  ;;  %v504_v53 = vpop.xlane.xlu0 %503 }
 0x3c1   :  { %2045 = vrcp.f32 %v504_v53 }
 0x3c2   :  { %v524_v52 = vpack.c.bf16 %v516_v51, %v516_v51 }
 0x3c4   :  { %v2491_v57 = vpop.f32.mrf.mxu2  ;;  %1817 = vmatmul.msk.bf16.vlgmr.msrb.gmra.mxu1 %vm237_vm3, %v524_v52  ;;  %v2267_v52 = vmov 32.0  }
 0x3c7   :  { %v2046_v58 = vpop.eup %2045 }
 0x3c8   :  { %v520_v62 = vmul.f32 %v2046_v58, %v2034_v30 }
 0x3ca   :  { %v528_v63 = vpack.c.bf16 %v520_v62, %v520_v62 }
 0x3cc   :  { %v549_v60 = vpop.f32.mrf.mxu2  ;;  %v501_v61 = vpop.xlane.xlu1 %500 }
 0x3cd   :  { %2047 = vrcp.f32 %v501_v61 }
 0x3ce   :  { %2049 = vrcp.f32 %v498_v45 }
 0x3cf   :  { %2051 = vrcp.f32 %v2267_v52 }
 0x3d3   :  { %v2048_v0 = vpop.eup %2047  ;;  %v657_v1 = vpop.permute.xlu0 %656 }
 0x3d4   :  { %v519_v2 = vmul.f32 %v2048_v0, %v2036_v35  ;;  %v662_v3 = vsel %vm534_vm4, %v657_v1, 0  ;;  %1821 = vmatmul.msk.bf16.vlgmr.msra.gmra.mxu1 %vm237_vm3, %v528_v63  ;;  %v2050_v5 = vpop.eup %2049 }
 0x3d5   :  { %671 = vmatpush.bf16.msra.mxu0 %v662_v3  ;;  %v518_v6 = vmul.f32 %v2050_v5, %v2470_v7  ;;  %v2052_v53 = vpop.eup %2051 }
 0x3d6   :  { %v527_v4 = vpack.c.bf16 %v519_v2, %v519_v2  ;;  %vm783_vm7 = vweird.f32 %v2052_v53 }
 0x3d7   :  { %v526_v10 = vpack.c.bf16 %v518_v6, %v518_v6 }
 0x3d8   :  { %1820 = vmatmul.msk.bf16.vlgmr.msra.gmra.mxu0 %vm237_vm3, %v527_v4 }
 0x3e3   :  { %v568_v8 = vpop.f32.mrf.mxu3 }
 0x3e4   :  { %v636_v56 = vpop.permute.xlu1 %635 }
 0x3e5   :  { %v641_v9 = vsel %vm534_vm4, %v636_v56, 0 }
 0x3e6   :  { %650 = vmatpush.bf16.msrb.mxu3 %v641_v9 }
 0x3e9   :  { %1819 = vmatmul.msk.bf16.vlgmr.msrb.gmra.mxu3 %vm237_vm3, %v526_v10 }
 0x3eb   :  { %v570_v11 = vpop.f32.mrf.mxu3 }
 0x3ec   :  { %v1913_v11 = vld [vmem:[#allocation8] sm:$0xff] }
 0x412   :  { %v589_v12 = vpop.f32.mrf.mxu0 }
 0x41a   :  { %v591_v13 = vpop.f32.mrf.mxu0 }
 0x43f   :  { %v631_v16 = vpop.f32.mrf.mxu2 }
 0x441   :  { %v610_v17 = vpop.f32.mrf.mxu1 }
 0x442   :  { %v1957_v18 = vpack.i.bf16 %v610_v17, %v589_v12 }
 0x444   :  { %1958 = vrot.lane.b32.xlu0 %v1957_v18, %s2264_s27 }
 0x447   :  { %v633_v19 = vpop.f32.mrf.mxu2 }
 0x449   :  { %v612_v20 = vpop.f32.mrf.mxu1 }
 0x451   :  { %v694_v7 = vpop.f32.mrf.mxu1 }
 0x455   :  { %v673_v21 = vpop.f32.mrf.mxu0 }
 0x456   :  { %v1967_v22 = vpack.i.bf16 %v694_v7, %v673_v21 }
 0x458   :  { %1968 = vrot.lane.b32.xlu2 %v1967_v22, %s2265_s3 }
 0x459   :  { %v696_v23 = vpop.f32.mrf.mxu1 }
 0x45d   :  { %v675_v24 = vpop.f32.mrf.mxu0 }
 0x46c   :  { %v652_v25 = vpop.f32.mrf.mxu3 }
 0x46d   :  { %v1962_v26 = vpack.i.bf16 %v652_v25, %v631_v16 }
 0x46f   :  { %1963 = vrot.lane.b32.xlu1 %v1962_v26, %s2266_s28 }
 0x474   :  { %v654_v27 = vpop.f32.mrf.mxu3 }
 0x4b2   :  { %v1969_v32 = vpop.permute.xlu2 %1968 }
 0x4b3   :  { %v1971_v36 = vunpack.i.h.bf16 %v1969_v32  ;;  %v1970_v37 = vunpack.i.l.bf16 %v1969_v32 }
 0x4b6   :  { %v1959_v30 = vpop.permute.xlu0 %1958 }
 0x4b7   :  { %v1961_v59 = vunpack.i.h.bf16 %v1959_v30  ;;  %v1960_v31 = vunpack.i.l.bf16 %v1959_v30 }
 0x4b9   :  { %v722_v38 = vsel %vm237_vm3, %v2491_v57, %v1960_v31  ;;  %v723_v39 = vsel %vm237_vm3, %v568_v8, %v1961_v59  ;;  %v779_v57 = vmul.f32 32.0, %v2052_v53  ;;  %v1914_v8 = vld [vmem:[#allocation8 + $0x8] sm:$0xff]  ;;  %v2006_v31 = vld [vmem:[%s2745_s13] ss:$0 sm:$0xff] }
 0x4ba   :  { %863 = vmatpush.bf16.msra.mxu3 %v1914_v8 }
 0x4bb   :  { %v780_v58 = vsub.f32 1.0, %v779_v57 }
 0x4bd   :  { %v781_v60 = vmul.f32 %v2052_v53, %v780_v58 }
 0x4be   :  { %864 = vmatpush.bf16.msra.mxu3 %v1913_v11 }
 0x4bf   :  { %v782_v61 = vadd.f32 %v2052_v53, %v781_v60 }
 0x4c1   :  { %v2518_v62 = vsel %vm783_vm7, %v2052_v53, %v782_v61 }
 0x4e1   :  { %v1964_v33 = vpop.permute.xlu1 %1963 }
 0x4e2   :  { %v1966_v34 = vunpack.i.h.bf16 %v1964_v33  ;;  %v1965_v35 = vunpack.i.l.bf16 %v1964_v33 }
 0x4e4   :  { %v726_v40 = vsel %vm724_vm5, %v723_v39, %v1966_v34  ;;  %v725_v42 = vsel %vm724_vm5, %v722_v38, %v1965_v35  ;;  %v1916_v38 = vld [vmem:[#allocation10 + $0x8] sm:$0xff]  ;;  %v1915_v39 = vld [vmem:[#allocation10] sm:$0xff] }
 0x4e5   :  { %v729_v43 = vsel %vm727_vm6, %v726_v40, %v1971_v36  ;;  %v728_v44 = vsel %vm727_vm6, %v725_v42, %v1970_v37  ;;  %903 = vmatpush.bf16.msrb.mxu0 %v1916_v38  ;;  %v2007_v42 = vld [vmem:[%s2741_s9] ss:$0 sm:$0xff] }
 0x4e6   :  { %v734_v45 = vpack.c.bf16 %v729_v43, %v728_v44 }
 0x4e8   :  { %1830 = vmatmul.msk.bf16.vlgmr.msra.gmra.mxu2 %vm186_vm2, %v734_v45 }
 0x4e9   :  { %904 = vmatpush.bf16.msrb.mxu0 %v1915_v39 }
 0x56b   :  { %v763_v47 = vpop.f32.mrf.mxu2 }
 0x56c   :  { %v764_v48 = vadd.f32 %v2004_v46, %v763_v47 }
 0x56e   :  { %v768_v41 = vadd.f32 %v764_v48, %v2393_v14 }
 0x570   :  { %v772_v49 = vsel %vm186_vm2, %v768_v41, 0.0 }
 0x571   :  { %773 = vadd.xlane.f32.xlu0 %v772_v49 }
 0x573   :  { %v765_v54 = vpop.f32.mrf.mxu2 }
 0x574   :  { %v766_v50 = vadd.f32 %v2004_v46, %v765_v54 }
 0x576   :  { %v769_v55 = vadd.f32 %v766_v50, %v2395_v15 }
 0x578   :  { %v775_v51 = vsel %vm186_vm2, %v769_v55, 0.0 }
 0x579   :  { %776 = vadd.xlane.f32.xlu1 %v775_v51 }
 0x5e4   :  { %v774_v14 = vpop.xlane.xlu0 %773 }
 0x5e5   :  { %v785_v63 = vmul.f32 %v2518_v62, %v774_v14 }
 0x5e7   :  { %v787_v0 = vsub.f32 %v768_v41, %v785_v63  ;;  %v2008_v41 = vld [vmem:[%s2743_s11] ss:$0 sm:$0xff] }
 0x5e9   :  { %v789_v1 = vmul.f32 %v787_v0, %v787_v0 }
 0x5eb   :  { %v791_v15 = vsel %vm186_vm2, %v789_v1, 0.0 }
 0x5ec   :  { %v777_v2 = vpop.xlane.xlu1 %776  ;;  %792 = vadd.xlane.f32.xlu2 %v791_v15 }
 0x5ed   :  { %v786_v3 = vmul.f32 %v2518_v62, %v777_v2 }
 0x5ef   :  { %v788_v4 = vsub.f32 %v769_v55, %v786_v3 }
 0x5f1   :  { %v790_v5 = vmul.f32 %v788_v4, %v788_v4 }
 0x5f3   :  { %v794_v6 = vsel %vm186_vm2, %v790_v5, 0.0 }
 0x5f4   :  { %795 = vadd.xlane.f32.xlu0 %v794_v6 }
 0x65f   :  { %v793_v56 = vpop.xlane.xlu2 %792 }
 0x660   :  { %v797_v9 = vmul.f32 %v793_v56, %v2518_v62  ;;  %v1917_v56 = vld [vmem:[#allocation5 + $0x10] sm:$0xff] }
 0x662   :  { %v799_v10 = vadd.f32 1e-05, %v797_v9 }
 0x664   :  { %2053 = vrsqrt.f32 %v799_v10  ;;  %vm807_vm9 = vweird.f32 %v799_v10 }
 0x667   :  { %v796_v12 = vpop.xlane.xlu0 %795 }
 0x668   :  { %v798_v13 = vmul.f32 %v796_v12, %v2518_v62 }
 0x66a   :  { %v2054_v16 = vpop.eup %2053  ;;  %v800_v17 = vadd.f32 1e-05, %v798_v13 }
 0x66b   :  { %v802_v18 = vmul.f32 %v2054_v16, %v799_v10  ;;  %vm808_vm8 = vweird.f32 %v2054_v16 }
 0x66c   :  { %2055 = vrsqrt.f32 %v800_v17  ;;  %vm809_vm10 = vmor %vm807_vm9, %vm808_vm8  ;;  %vm817_vm12 = vweird.f32 %v800_v17 }
 0x66d   :  { %v803_v19 = vmul.f32 %v2054_v16, %v802_v18 }
 0x66f   :  { %v804_v20 = vmul.f32 0.5, %v803_v19 }
 0x671   :  { %v805_v7 = vsub.f32 1.5, %v804_v20 }
 0x672   :  { %v2056_v21 = vpop.eup %2055 }
 0x673   :  { %v806_v22 = vmul.f32 %v2054_v16, %v805_v7  ;;  %v812_v23 = vmul.f32 %v2056_v21, %v800_v17  ;;  %vm818_vm11 = vweird.f32 %v2056_v21 }
 0x674   :  { %vm819_vm13 = vmor %vm817_vm12, %vm818_vm11 }
 0x675   :  { %v813_v24 = vmul.f32 %v2056_v21, %v812_v23  ;;  %v810_v25 = vsel %vm809_vm10, %v2054_v16, %v806_v22 }
 0x676   :  { %v821_v29 = vmul.f32 %v810_v25, %v787_v0  ;;  %v2009_v25 = vld [vmem:[%s2746_s14] ss:$0 sm:$0xff] }
 0x677   :  { %v814_v26 = vmul.f32 0.5, %v813_v24 }
 0x678   :  { %v826_v32 = vmul.f32 %v2005_v28, %v821_v29  ;;  %v2010_v29 = vld [vmem:[%s2747_s15] ss:$0 sm:$0xff] }
 0x679   :  { %v815_v27 = vsub.f32 1.5, %v814_v26 }
 0x67a   :  { %v831_v35 = vadd.f32 %v2006_v31, %v826_v32 }
 0x67b   :  { %v816_v30 = vmul.f32 %v2056_v21, %v815_v27 }
 0x67d   :  { %v820_v59 = vsel %vm819_vm13, %v2056_v21, %v816_v30 }
 0x67e   :  { %v822_v33 = vmul.f32 %v820_v59, %v788_v4  ;;  %v1918_v4 = vld [vmem:[#allocation5 + $0x18] sm:$0xff] }
 0x67f   :  { %1001 = vmatpush.bf16.msrb.mxu1 %v1918_v4 }
 0x680   :  { %v827_v34 = vmul.f32 %v2005_v28, %v822_v33 }
 0x682   :  { %v832_v36 = vadd.f32 %v2006_v31, %v827_v34 }
 0x683   :  { %1002 = vmatpush.bf16.msrb.mxu1 %v1917_v56 }
 0x684   :  { %v837_v37 = vpack.c.bf16 %v832_v36, %v831_v35 }
 0x686   :  { %1839 = vmatmul.msk.bf16.vlgmr.msra.gmra.mxu3 %vm186_vm2, %v837_v37 }
 0x709   :  { %v866_v40 = vpop.f32.mrf.mxu3 }
 0x70a   :  { %v867_v43 = vadd.f32 %v2007_v42, %v866_v40 }
 0x70c   :  { %v871_v46 = vmax.f32 %v867_v43, 0.0 }
 0x711   :  { %v868_v44 = vpop.f32.mrf.mxu3 }
 0x712   :  { %v869_v45 = vadd.f32 %v2007_v42, %v868_v44 }
 0x714   :  { %v872_v47 = vmax.f32 %v869_v45, 0.0 }
 0x716   :  { %v877_v48 = vpack.c.bf16 %v872_v47, %v871_v46 }
 0x718   :  { %1848 = vmatmul.msk.bf16.vlgmr.msrb.gmra.mxu0 %vm186_vm2, %v877_v48 }
 0x795   :  { %v906_v49 = vpop.f32.mrf.mxu0 }
 0x796   :  { %v907_v54 = vadd.f32 %v2008_v41, %v906_v49 }
 0x798   :  { %v911_v50 = vadd.f32 %v907_v54, %v831_v35 }
 0x79a   :  { %v915_v55 = vsel %vm186_vm2, %v911_v50, 0.0 }
 0x79b   :  { %916 = vadd.xlane.f32.xlu1 %v915_v55 }
 0x79d   :  { %v908_v51 = vpop.f32.mrf.mxu0 }
 0x79e   :  { %v909_v52 = vadd.f32 %v2008_v41, %v908_v51 }
 0x7a0   :  { %v912_v53 = vadd.f32 %v909_v52, %v832_v36  ;;  %v2011_v36 = vld [vmem:[%s2737_s5 + $0x1] ss:$0 sm:$0xff] }
 0x7a2   :  { %v918_v57 = vsel %vm186_vm2, %v912_v53, 0.0 }
 0x7a3   :  { %919 = vadd.xlane.f32.xlu2 %v918_v57 }
 0x80e   :  { %v917_v58 = vpop.xlane.xlu1 %916 }
 0x80f   :  { %v921_v60 = vmul.f32 %v917_v58, %v2518_v62 }
 0x811   :  { %v923_v61 = vsub.f32 %v911_v50, %v921_v60 }
 0x813   :  { %v925_v14 = vmul.f32 %v923_v61, %v923_v61 }
 0x815   :  { %v927_v63 = vsel %vm186_vm2, %v925_v14, 0.0 }
 0x816   :  { %v920_v0 = vpop.xlane.xlu2 %919  ;;  %928 = vadd.xlane.f32.xlu0 %v927_v63 }
 0x817   :  { %v922_v1 = vmul.f32 %v920_v0, %v2518_v62 }
 0x819   :  { %v924_v15 = vsub.f32 %v912_v53, %v922_v1 }
 0x81b   :  { %v926_v2 = vmul.f32 %v924_v15, %v924_v15 }
 0x81d   :  { %v930_v3 = vsel %vm186_vm2, %v926_v2, 0.0 }
 0x81e   :  { %931 = vadd.xlane.f32.xlu1 %v930_v3 }
 0x889   :  { %v929_v5 = vpop.xlane.xlu0 %928 }
 0x88a   :  { %v933_v6 = vmul.f32 %v929_v5, %v2518_v62 }
 0x88c   :  { %v935_v8 = vadd.f32 1e-05, %v933_v6 }
 0x88e   :  { %2057 = vrsqrt.f32 %v935_v8  ;;  %vm943_vm15 = vweird.f32 %v935_v8 }
 0x891   :  { %v932_v9 = vpop.xlane.xlu1 %931 }
 0x892   :  { %v934_v10 = vmul.f32 %v932_v9, %v2518_v62 }
 0x894   :  { %v2058_v11 = vpop.eup %2057  ;;  %v936_v12 = vadd.f32 1e-05, %v934_v10 }
 0x895   :  { %v938_v13 = vmul.f32 %v2058_v11, %v935_v8  ;;  %vm944_vm14 = vweird.f32 %v2058_v11 }
 0x896   :  { %2059 = vrsqrt.f32 %v936_v12  ;;  %vm945_vm0 = vmor %vm943_vm15, %vm944_vm14  ;;  %vm953_vm7 = vweird.f32 %v936_v12 }
 0x897   :  { %v939_v16 = vmul.f32 %v2058_v11, %v938_v13 }
 0x899   :  { %v940_v17 = vmul.f32 0.5, %v939_v16 }
 0x89b   :  { %v941_v18 = vsub.f32 1.5, %v940_v17 }
 0x89c   :  { %v2060_v19 = vpop.eup %2059 }
 0x89d   :  { %v942_v20 = vmul.f32 %v2058_v11, %v941_v18  ;;  %v948_v7 = vmul.f32 %v2060_v19, %v936_v12  ;;  %vm954_vm1 = vweird.f32 %v2060_v19 }
 0x89e   :  { %vm955_vm8 = vmor %vm953_vm7, %vm954_vm1 }
 0x89f   :  { %v949_v21 = vmul.f32 %v2060_v19, %v948_v7  ;;  %v946_v22 = vsel %vm945_vm0, %v2058_v11, %v942_v20 }
 0x8a0   :  { %v957_v26 = vmul.f32 %v946_v22, %v923_v61 }
 0x8a1   :  { %v950_v23 = vmul.f32 0.5, %v949_v21 }
 0x8a2   :  { %v962_v30 = vmul.f32 %v2009_v25, %v957_v26 }
 0x8a3   :  { %v951_v24 = vsub.f32 1.5, %v950_v23 }
 0x8a4   :  { %v2554_v32 = vadd.f32 %v2010_v29, %v962_v30 }
 0x8a5   :  { %v952_v27 = vmul.f32 %v2060_v19, %v951_v24 }
 0x8a7   :  { %v956_v28 = vsel %vm955_vm8, %v2060_v19, %v952_v27 }
 0x8a8   :  { %v958_v59 = vmul.f32 %v956_v28, %v924_v15 }
 0x8aa   :  { %v963_v31 = vmul.f32 %v2009_v25, %v958_v59 }
 0x8ac   :  { %v2556_v33 = vadd.f32 %v2010_v29, %v963_v31 }
 0x8ae   :  { %v974_v34 = vpack.c.bf16 %v2556_v33, %v2554_v32 }
 0x8b0   :  { %1858 = vmatmul.msk.bf16.vlgmr.msrb.gmra.mxu1 %vm186_vm2, %v974_v34 }
 0x92d   :  { %v1004_v35 = vpop.f32.mrf.mxu1 }
 0x92e   :  { %v1005_v37 = vadd.f32 %v2011_v36, %v1004_v35 }
 0x930   :  { %v1029_v42 = vpack.c.bf16 %v1005_v37, %v1005_v37 }
 0x932   :  { %v1038_v44 = vunpack.c.l.b16 %v1029_v42 }
 0x934   :  { %v2567_v46 = vpack.c.b16 %v1038_v44, %v1038_v44 }
 0x935   :  { %v1006_v38 = vpop.f32.mrf.mxu1 }
 0x936   :  { %v1007_v39 = vadd.f32 %v2011_v36, %v1006_v38 }
 0x938   :  { %v1982_v40 = vpack.i.bf16 %v1007_v39, %v1005_v37  ;;  %v1030_v43 = vpack.c.bf16 %v1007_v39, %v1007_v39 }
 0x93a   :  { %1983 = vrot.lane.b32.xlu1 %v1982_v40, %s2260_s1  ;;  %1978 = vrot.lane.b32.xlu0 %v1982_v40, %s2263_s26  ;;  %v1062_v45 = vunpack.c.l.b16 %v1030_v43 }
 0x93b   :  { %1973 = vrot.lane.b32.xlu2 %v1982_v40, %s2261_s23 }
 0x93c   :  { %v2569_v47 = vpack.c.b16 %v1062_v45, %v1062_v45 }
 0x942   :  { %1040 = vrot.lane.b32.xlu0 %v2567_v46, %s2262_s25 }
 0x943   :  { %1064 = vrot.lane.b32.xlu2 %v2569_v47, %s2262_s25 }
 0x995   :  { %v1974_v48 = vpop.permute.xlu2 %1973 }
 0x996   :  { %v1976_v41 = vunpack.i.h.bf16 %v1974_v48  ;;  %v1975_v49 = vunpack.i.l.bf16 %v1974_v48 }
 0x998   :  { %v1032_v54 = vpack.c.bf16 %v1976_v41, %v1976_v41  ;;  %v1031_v50 = vpack.c.bf16 %v1975_v49, %v1975_v49 }
 0x99a   :  { %v1110_v55 = vunpack.c.l.b16 %v1032_v54  ;;  %v1086_v51 = vunpack.c.l.b16 %v1031_v50 }
 0x99c   :  { %v2575_v52 = vpack.c.b16 %v1086_v51, %v1086_v51  ;;  %v2577_v53 = vpack.c.b16 %v1110_v55, %v1110_v55 }
 0x99d   :  { %v1065_v57 = vpop.permute.xlu2 %1064 }
 0x99e   :  { %v1070_v58 = vsel %vm237_vm3, %v1065_v57, 0  ;;  %1088 = vrot.lane.b32.xlu1 %v2575_v52, %s2262_s25  ;;  %1112 = vrot.lane.b32.xlu0 %v2577_v53, %s2262_s25 }
 0x99f   :  { %1079 = vmatpush.bf16.xpose.msrb.mxu3 %v1070_v58 }
 0x9a6   :  { %1860 = vmatmul.msk.bf16.vlgmr.msrb.gmra.mxu3 %vm237_vm3, %v1030_v43 }
 0x9ac   :  { %v1984_v60 = vpop.permute.xlu1 %1983  ;;  %v1979_v61 = vpop.permute.xlu0 %1978 }
 0x9ad   :  { %v1985_v14 = vunpack.i.l.bf16 %v1984_v60  ;;  %v1981_v63 = vunpack.i.h.bf16 %v1979_v61  ;;  %v1980_v0 = vunpack.i.l.bf16 %v1979_v61  ;;  %v1986_v1 = vunpack.i.h.bf16 %v1984_v60 }
 0x9af   :  { %v1035_v15 = vpack.c.bf16 %v1985_v14, %v1985_v14  ;;  %v1034_v2 = vpack.c.bf16 %v1981_v63, %v1981_v63  ;;  %v1033_v3 = vpack.c.bf16 %v1980_v0, %v1980_v0  ;;  %v1036_v8 = vpack.c.bf16 %v1986_v1, %v1986_v1 }
 0x9b1   :  { %v1182_v4 = vunpack.c.l.b16 %v1035_v15  ;;  %v1158_v5 = vunpack.c.l.b16 %v1034_v2  ;;  %v1134_v6 = vunpack.c.l.b16 %v1033_v3  ;;  %v1206_v13 = vunpack.c.l.b16 %v1036_v8 }
 0x9b3   :  { %v2585_v56 = vpack.c.b16 %v1134_v6, %v1134_v6  ;;  %v2587_v9 = vpack.c.b16 %v1158_v5, %v1158_v5  ;;  %v2589_v10 = vpack.c.b16 %v1182_v4, %v1182_v4  ;;  %v2598_v16 = vpack.c.b16 %v1206_v13, %v1206_v13 }
 0x9b4   :  { %v1041_v11 = vpop.permute.xlu0 %1040 }
 0x9b5   :  { %v1046_v12 = vsel %vm237_vm3, %v1041_v11, 0  ;;  %1136 = vrot.lane.b32.xlu2 %v2585_v56, %s2262_s25  ;;  %1160 = vrot.lane.b32.xlu1 %v2587_v9, %s2262_s25 }
 0x9b6   :  { %1184 = vrot.lane.b32.xlu0 %v2589_v10, %s2262_s25  ;;  %1055 = vmatpush.bf16.xpose.msrb.mxu2 %v1046_v12 }
 0x9bd   :  { %1208 = vrot.lane.b32.xlu2 %v2598_v16, %s2262_s25  ;;  %1859 = vmatmul.msk.bf16.vlgmr.msrb.gmra.mxu2 %vm237_vm3, %v1029_v42 }
 0xa0f   :  { %v1137_v17 = vpop.permute.xlu2 %1136 }
 0xa10   :  { %v1142_v18 = vsel %vm237_vm3, %v1137_v17, 0  ;;  %v1089_v19 = vpop.permute.xlu1 %1088  ;;  %v1113_v20 = vpop.permute.xlu0 %1112 }
 0xa11   :  { %v1094_v7 = vsel %vm237_vm3, %v1089_v19, 0  ;;  %v1118_v21 = vsel %vm237_vm3, %v1113_v20, 0  ;;  %1151 = vmatpush.bf16.xpose.msra.mxu2 %v1142_v18 }
 0xa12   :  { %1103 = vmatpush.bf16.xpose.msra.mxu0 %v1094_v7  ;;  %1127 = vmatpush.bf16.xpose.msra.mxu1 %v1118_v21 }
 0xa17   :  { %v1209_v22 = vpop.permute.xlu2 %1208 }
 0xa18   :  { %v1214_v23 = vsel %vm237_vm3, %v1209_v22, 0  ;;  %1863 = vmatmul.msk.bf16.vlgmr.msra.gmra.mxu2 %vm237_vm3, %v1033_v3 }
 0xa19   :  { %1861 = vmatmul.msk.bf16.vlgmr.msra.gmra.mxu0 %vm237_vm3, %v1031_v50  ;;  %1862 = vmatmul.msk.bf16.vlgmr.msra.gmra.mxu1 %vm237_vm3, %v1032_v54 }
 0xa1a   :  { %1223 = vmatpush.bf16.xpose.msrb.mxu1 %v1214_v23 }
 0xa27   :  { %v1161_v24 = vpop.permute.xlu1 %1160 }
 0xa28   :  { %v1166_v25 = vsel %vm237_vm3, %v1161_v24, 0  ;;  %v1185_v26 = vpop.permute.xlu0 %1184 }
 0xa29   :  { %v1190_v27 = vsel %vm237_vm3, %v1185_v26, 0  ;;  %v1081_v28 = vpop.f32.mrf.mxu3  ;;  %1866 = vmatmul.msk.bf16.vlgmr.msrb.gmra.mxu1 %vm237_vm3, %v1036_v8  ;;  %1175 = vmatpush.bf16.xpose.msra.mxu3 %v1166_v25 }
 0xa2a   :  { %v1230_v29 = vmul.f32 0.35355338, %v1081_v28  ;;  %1199 = vmatpush.bf16.xpose.msrb.mxu0 %v1190_v27 }
 0xa2c   :  { %v1240_v30 = vsel %vm237_vm3, %v1230_v29, -inf }
 0xa2d   :  { %1241 = vmax.xlane.f32.xlu0 %v1240_v30 }
 0xa30   :  { %1864 = vmatmul.msk.bf16.vlgmr.msra.gmra.mxu3 %vm237_vm3, %v1034_v2 }
 0xa31   :  { %v1083_v59 = vpop.f32.mrf.mxu3  ;;  %1865 = vmatmul.msk.bf16.vlgmr.msrb.gmra.mxu0 %vm237_vm3, %v1035_v15 }
 0xa40   :  { %v1057_v31 = vpop.f32.mrf.mxu2 }
 0xa41   :  { %v1229_v34 = vmul.f32 0.35355338, %v1057_v31 }
 0xa43   :  { %v1237_v35 = vsel %vm237_vm3, %v1229_v34, -inf }
 0xa44   :  { %1238 = vmax.xlane.f32.xlu1 %v1237_v35 }
 0xa48   :  { %v1059_v36 = vpop.f32.mrf.mxu2 }
 0xa96   :  { %v1105_v37 = vpop.f32.mrf.mxu0  ;;  %v1129_v38 = vpop.f32.mrf.mxu1 }
 0xa97   :  { %v1231_v39 = vmul.f32 0.35355338, %v1105_v37  ;;  %v1232_v40 = vmul.f32 0.35355338, %v1129_v38 }
 0xa99   :  { %v1243_v42 = vsel %vm237_vm3, %v1231_v39, -inf  ;;  %v1246_v43 = vsel %vm237_vm3, %v1232_v40, -inf }
 0xa9a   :  { %1244 = vmax.xlane.f32.xlu2 %v1243_v42  ;;  %1247 = vmax.xlane.f32.xlu1 %v1246_v43 }
 0xa9b   :  { %v1153_v44 = vpop.f32.mrf.mxu2 }
 0xa9c   :  { %v1233_v45 = vmul.f32 0.35355338, %v1153_v44 }
 0xa9e   :  { %v1107_v48 = vpop.f32.mrf.mxu0  ;;  %v1131_v41 = vpop.f32.mrf.mxu1  ;;  %v1249_v49 = vsel %vm237_vm3, %v1233_v45, -inf }
 0xa9f   :  { %1250 = vmax.xlane.f32.xlu0 %v1249_v49 }
 0xaa0   :  { %v1242_v14 = vpop.xlane.xlu0 %1241 }
 0xaa1   :  { %v1262_v0 = vsub.f32 %v1230_v29, %v1242_v14 }
 0xaa3   :  { %v1155_v54 = vpop.f32.mrf.mxu2  ;;  %v1271_v2 = vmul.f32 1.442695, %v1262_v0 }
 0xaa6   :  { %v1225_v50 = vpop.f32.mrf.mxu1 }
 0xaa7   :  { %v1236_v4 = vmul.f32 0.35355338, %v1225_v50 }
 0xaa9   :  { %v1258_v8 = vsel %vm237_vm3, %v1236_v4, -inf }
 0xaae   :  { %v1201_v55 = vpop.f32.mrf.mxu0  ;;  %v1227_v51 = vpop.f32.mrf.mxu1 }
 0xab2   :  { %1375 = vrot.lane.b32.xlu2 %v2575_v52, %s2254_s29  ;;  %v1235_v52 = vmul.f32 0.35355338, %v1201_v55 }
 0xab3   :  { %1333 = vrot.lane.b32.xlu1 %v2567_v46, %s2254_s29  ;;  %v1177_v57 = vpop.f32.mrf.mxu3  ;;  %1354 = vrot.lane.b32.xlu0 %v2569_v47, %s2254_s29 }
 0xab4   :  { %v1234_v15 = vmul.f32 0.35355338, %v1177_v57  ;;  %v1255_v47 = vsel %vm237_vm3, %v1235_v52, -inf }
 0xab6   :  { %v1203_v58 = vpop.f32.mrf.mxu0  ;;  %v1252_v46 = vsel %vm237_vm3, %v1234_v15, -inf }
 0xab7   :  { %v1239_v61 = vpop.xlane.xlu1 %1238 }
 0xab8   :  { %v1261_v63 = vsub.f32 %v1229_v34, %v1239_v61 }
 0xaba   :  { %v1269_v1 = vmul.f32 1.442695, %v1261_v63 }
 0xabb   :  { %v1179_v60 = vpop.f32.mrf.mxu3  ;;  %1396 = vrot.lane.b32.xlu0 %v2577_v53, %s2254_s29 }
 0xabc   :  { %2061 = vpow2.f32 %v1269_v1 }
 0xabd   :  { %2063 = vpow2.f32 %v1271_v2 }
 0xac2   :  { %v2630_v3 = vpop.eup %2061 }
 0xac3   :  { %v2632_v53 = vpop.eup %2063  ;;  %v1285_v5 = vsel %vm237_vm3, %v2630_v3, 0.0 }
 0xac4   :  { %v1288_v6 = vsel %vm237_vm3, %v2632_v53, 0.0 }
 0xadb   :  { %1253 = vmax.xlane.f32.xlu2 %v1252_v46 }
 0xadd   :  { %1256 = vmax.xlane.f32.xlu1 %v1255_v47 }
 0xae3   :  { %1286 = vadd.xlane.f32.xlu2 %v1285_v5 }
 0xae5   :  { %1289 = vadd.xlane.f32.xlu1 %v1288_v6  ;;  %1259 = vmax.xlane.f32.xlu0 %v1258_v8 }
 0xb0d   :  { %v1245_v11 = vpop.xlane.xlu2 %1244  ;;  %v1248_v12 = vpop.xlane.xlu1 %1247 }
 0xb0e   :  { %v1263_v13 = vsub.f32 %v1231_v39, %v1245_v11  ;;  %v1264_v17 = vsub.f32 %v1232_v40, %v1248_v12 }
 0xb10   :  { %v1273_v18 = vmul.f32 1.442695, %v1263_v13  ;;  %v1275_v19 = vmul.f32 1.442695, %v1264_v17 }
 0xb12   :  { %2065 = vpow2.f32 %v1273_v18  ;;  %v1251_v20 = vpop.xlane.xlu0 %1250 }
 0xb13   :  { %2067 = vpow2.f32 %v1275_v19  ;;  %v1265_v7 = vsub.f32 %v1233_v45, %v1251_v20 }
 0xb15   :  { %v1277_v21 = vmul.f32 1.442695, %v1265_v7  ;;  %v1376_v22 = vpop.permute.xlu2 %1375 }
 0xb16   :  { %v1381_v23 = vsel %vm534_vm4, %v1376_v22, 0 }
 0xb17   :  { %2069 = vpow2.f32 %v1277_v21  ;;  %1390 = vmatpush.bf16.msra.mxu0 %v1381_v23 }
 0xb18   :  { %v2066_v24 = vpop.eup %2065 }
 0xb19   :  { %v2068_v25 = vpop.eup %2067  ;;  %v1291_v26 = vsel %vm237_vm3, %v2066_v24, 0.0 }
 0xb1a   :  { %v1294_v27 = vsel %vm237_vm3, %v2068_v25, 0.0  ;;  %1292 = vadd.xlane.f32.xlu0 %v1291_v26 }
 0xb1b   :  { %1295 = vadd.xlane.f32.xlu2 %v1294_v27 }
 0xb1d   :  { %v2642_v28 = vpop.eup %2069 }
 0xb1e   :  { %v1297_v29 = vsel %vm237_vm3, %v2642_v28, 0.0 }
 0xb1f   :  { %1298 = vadd.xlane.f32.xlu1 %v1297_v29 }
 0xb25   :  { %v1334_v30 = vpop.permute.xlu1 %1333  ;;  %v1355_v59 = vpop.permute.xlu0 %1354 }
 0xb26   :  { %v1339_v31 = vsel %vm534_vm4, %v1334_v30, 0  ;;  %v1360_v34 = vsel %vm534_vm4, %v1355_v59, 0 }
 0xb27   :  { %1348 = vmatpush.bf16.msrb.mxu2 %v1339_v31  ;;  %1369 = vmatpush.bf16.msrb.mxu3 %v1360_v34 }
 0xb2d   :  { %v1397_v35 = vpop.permute.xlu0 %1396 }
 0xb2e   :  { %1438 = vrot.lane.b32.xlu0 %v2587_v9, %s2254_s29  ;;  %v1402_v36 = vsel %vm534_vm4, %v1397_v35, 0 }
 0xb2f   :  { %1411 = vmatpush.bf16.msra.mxu1 %v1402_v36 }
 0xb38   :  { %1417 = vrot.lane.b32.xlu1 %v2585_v56, %s2254_s29 }
 0xb4e   :  { %v1254_v37 = vpop.xlane.xlu2 %1253 }
 0xb4f   :  { %v1266_v38 = vsub.f32 %v1234_v15, %v1254_v37 }
 0xb50   :  { %v1257_v39 = vpop.xlane.xlu1 %1256 }
 0xb51   :  { %v1279_v40 = vmul.f32 1.442695, %v1266_v38  ;;  %v1267_v42 = vsub.f32 %v1235_v52, %v1257_v39 }
 0xb53   :  { %2071 = vpow2.f32 %v1279_v40  ;;  %v1281_v43 = vmul.f32 1.442695, %v1267_v42 }
 0xb55   :  { %2073 = vpow2.f32 %v1281_v43 }
 0xb56   :  { %v1287_v44 = vpop.xlane.xlu2 %1286 }
 0xb57   :  { %2075 = vrcp.f32 %v1287_v44 }
 0xb58   :  { %v1290_v45 = vpop.xlane.xlu1 %1289  ;;  %v1260_v48 = vpop.xlane.xlu0 %1259 }
 0xb59   :  { %v2072_v41 = vpop.eup %2071  ;;  %2077 = vrcp.f32 %v1290_v45  ;;  %v1268_v9 = vsub.f32 %v1236_v4, %v1260_v48 }
 0xb5a   :  { %v1300_v49 = vsel %vm237_vm3, %v2072_v41, 0.0 }
 0xb5b   :  { %v2074_v54 = vpop.eup %2073  ;;  %v1283_v50 = vmul.f32 1.442695, %v1268_v9  ;;  %1301 = vadd.xlane.f32.xlu2 %v1300_v49 }
 0xb5c   :  { %v1303_v56 = vsel %vm237_vm3, %v2074_v54, 0.0 }
 0xb5d   :  { %v2076_v55 = vpop.eup %2075  ;;  %2079 = vpow2.f32 %v1283_v50  ;;  %1304 = vadd.xlane.f32.xlu0 %v1303_v56  ;;  %v1920_v50 = vld [vmem:[#allocation7 + $0x18] sm:$0xff]  ;;  %v1919_v56 = vld [vmem:[#allocation7 + $0x10] sm:$0xff] }
 0xb5e   :  { %v1317_v51 = vmul.f32 %v2076_v55, %v2630_v3 }
 0xb5f   :  { %v2078_v57 = vpop.eup %2077 }
 0xb60   :  { %v1325_v58 = vpack.c.bf16 %v1317_v51, %v1317_v51  ;;  %v1318_v60 = vmul.f32 %v2078_v57, %v2632_v53 }
 0xb62   :  { %v1326_v61 = vpack.c.bf16 %v1318_v60, %v1318_v60  ;;  %1867 = vmatmul.msk.bf16.vlgmr.msrb.gmra.mxu2 %vm237_vm3, %v1325_v58 }
 0xb63   :  { %v2080_v14 = vpop.eup %2079 }
 0xb64   :  { %1868 = vmatmul.msk.bf16.vlgmr.msrb.gmra.mxu3 %vm237_vm3, %v1326_v61  ;;  %v1306_v63 = vsel %vm237_vm3, %v2080_v14, 0.0 }
 0xb65   :  { %1307 = vadd.xlane.f32.xlu2 %v1306_v63 }
 0xb71   :  { %1480 = vrot.lane.b32.xlu0 %v2598_v16, %s2254_s29 }
 0xb7d   :  { %1459 = vrot.lane.b32.xlu2 %v2589_v10, %s2254_s29 }
 0xb8d   :  { %v1293_v0 = vpop.xlane.xlu0 %1292 }
 0xb8e   :  { %v1296_v1 = vpop.xlane.xlu2 %1295  ;;  %2081 = vrcp.f32 %v1293_v0 }
 0xb8f   :  { %2083 = vrcp.f32 %v1296_v1 }
 0xb92   :  { %v1299_v4 = vpop.xlane.xlu1 %1298 }
 0xb93   :  { %2085 = vrcp.f32 %v1299_v4  ;;  %v2012_v4 = vld [vmem:[%s2739_s7 + $0x1] ss:$0 sm:$0xff] }
 0xb94   :  { %v2082_v15 = vpop.eup %2081 }
 0xb95   :  { %v2084_v2 = vpop.eup %2083  ;;  %v1319_v52 = vmul.f32 %v2082_v15, %v2066_v24 }
 0xb96   :  { %v1320_v46 = vmul.f32 %v2084_v2, %v2068_v25 }
 0xb97   :  { %v1327_v47 = vpack.c.bf16 %v1319_v52, %v1319_v52 }
 0xb98   :  { %v1328_v3 = vpack.c.bf16 %v1320_v46, %v1320_v46 }
 0xb99   :  { %1869 = vmatmul.msk.bf16.vlgmr.msra.gmra.mxu0 %vm237_vm3, %v1327_v47  ;;  %v2086_v10 = vpop.eup %2085 }
 0xb9a   :  { %1870 = vmatmul.msk.bf16.vlgmr.msra.gmra.mxu1 %vm237_vm3, %v1328_v3  ;;  %v1321_v5 = vmul.f32 %v2086_v10, %v2642_v28 }
 0xb9c   :  { %v1329_v11 = vpack.c.bf16 %v1321_v5, %v1321_v5 }
 0xba0   :  { %v1439_v16 = vpop.permute.xlu0 %1438 }
 0xba1   :  { %v1444_v53 = vsel %vm534_vm4, %v1439_v16, 0 }
 0xba2   :  { %1453 = vmatpush.bf16.msra.mxu3 %v1444_v53 }
 0xbaa   :  { %v1418_v6 = vpop.permute.xlu1 %1417 }
 0xbab   :  { %v1423_v8 = vsel %vm534_vm4, %v1418_v6, 0 }
 0xbac   :  { %1432 = vmatpush.bf16.msra.mxu2 %v1423_v8 }
 0xbaf   :  { %1871 = vmatmul.msk.bf16.vlgmr.msra.gmra.mxu2 %vm237_vm3, %v1329_v11 }
 0xbb0   :  { %1563 = vmatpush.bf16.msrb.mxu2 %v1920_v50 }
 0xbb4   :  { %1564 = vmatpush.bf16.msrb.mxu2 %v1919_v56 }
 0xbce   :  { %v1302_v12 = vpop.xlane.xlu2 %1301 }
 0xbcf   :  { %2087 = vrcp.f32 %v1302_v12 }
 0xbd0   :  { %v1305_v13 = vpop.xlane.xlu0 %1304 }
 0xbd1   :  { %2089 = vrcp.f32 %v1305_v13 }
 0xbd5   :  { %v2088_v17 = vpop.eup %2087 }
 0xbd6   :  { %v1322_v18 = vmul.f32 %v2088_v17, %v2072_v41 }
 0xbd7   :  { %v2090_v7 = vpop.eup %2089 }
 0xbd8   :  { %v1330_v19 = vpack.c.bf16 %v1322_v18, %v1322_v18  ;;  %v1308_v20 = vpop.xlane.xlu2 %1307  ;;  %v1323_v22 = vmul.f32 %v2090_v7, %v2074_v54 }
 0xbd9   :  { %2091 = vrcp.f32 %v1308_v20 }
 0xbda   :  { %1872 = vmatmul.msk.bf16.vlgmr.msra.gmra.mxu3 %vm237_vm3, %v1330_v19  ;;  %v1331_v26 = vpack.c.bf16 %v1323_v22, %v1323_v22 }
 0xbdf   :  { %v2092_v21 = vpop.eup %2091 }
 0xbe0   :  { %v1460_v23 = vpop.permute.xlu2 %1459  ;;  %v1324_v25 = vmul.f32 %v2092_v21, %v2080_v14 }
 0xbe1   :  { %v1465_v24 = vsel %vm534_vm4, %v1460_v23, 0 }
 0xbe2   :  { %1474 = vmatpush.bf16.msrb.mxu0 %v1465_v24  ;;  %v1332_v30 = vpack.c.bf16 %v1324_v25, %v1324_v25 }
 0xbe3   :  { %v1481_v27 = vpop.permute.xlu0 %1480 }
 0xbe4   :  { %v1486_v28 = vsel %vm534_vm4, %v1481_v27, 0  ;;  %v1921_v27 = vld [vmem:[#allocation8 + $0x10] sm:$0xff] }
 0xbe5   :  { %v1350_v29 = vpop.f32.mrf.mxu2  ;;  %1495 = vmatpush.bf16.msrb.mxu1 %v1486_v28  ;;  %1873 = vmatmul.msk.bf16.vlgmr.msrb.gmra.mxu0 %vm237_vm3, %v1331_v26 }
 0xbe7   :  { %v1371_v59 = vpop.f32.mrf.mxu3 }
 0xbe8   :  { %1874 = vmatmul.msk.bf16.vlgmr.msrb.gmra.mxu1 %vm237_vm3, %v1332_v30 }
 0xbed   :  { %v1352_v31 = vpop.f32.mrf.mxu2 }
 0xbef   :  { %v1373_v34 = vpop.f32.mrf.mxu3 }
 0xc16   :  { %v1392_v35 = vpop.f32.mrf.mxu0 }
 0xc17   :  { %v1413_v36 = vpop.f32.mrf.mxu1 }
 0xc18   :  { %v1987_v37 = vpack.i.bf16 %v1413_v36, %v1392_v35 }
 0xc1a   :  { %1988 = vrot.lane.b32.xlu1 %v1987_v37, %s2264_s27 }
 0xc1e   :  { %v1394_v38 = vpop.f32.mrf.mxu0 }
 0xc1f   :  { %v1415_v39 = vpop.f32.mrf.mxu1 }
 0xc32   :  { %v1434_v40 = vpop.f32.mrf.mxu2 }
 0xc3a   :  { %v1436_v42 = vpop.f32.mrf.mxu2 }
 0xc5d   :  { %v1455_v43 = vpop.f32.mrf.mxu3 }
 0xc5e   :  { %v1992_v44 = vpack.i.bf16 %v1455_v43, %v1434_v40 }
 0xc60   :  { %1993 = vrot.lane.b32.xlu2 %v1992_v44, %s2266_s28 }
 0xc62   :  { %v1476_v45 = vpop.f32.mrf.mxu0 }
 0xc65   :  { %v1457_v48 = vpop.f32.mrf.mxu3  ;;  %v1497_v41 = vpop.f32.mrf.mxu1 }
 0xc66   :  { %v1997_v9 = vpack.i.bf16 %v1497_v41, %v1476_v45  ;;  %v2013_v45 = vld [vmem:[%s2744_s12 + $0x1] ss:$0 sm:$0xff] }
 0xc68   :  { %1998 = vrot.lane.b32.xlu0 %v1997_v9, %s2265_s3 }
 0xc6a   :  { %v1478_v49 = vpop.f32.mrf.mxu0 }
 0xc6b   :  { %v2014_v49 = vld [vmem:[%s2745_s13 + $0x1] ss:$0 sm:$0xff] }
 0xc6d   :  { %v1499_v54 = vpop.f32.mrf.mxu1 }
 0xc8c   :  { %v1989_v55 = vpop.permute.xlu1 %1988 }
 0xc8d   :  { %v1991_v57 = vunpack.i.h.bf16 %v1989_v55  ;;  %v1990_v58 = vunpack.i.l.bf16 %v1989_v55 }
 0xc8f   :  { %v1526_v63 = vsel %vm237_vm3, %v1371_v59, %v1991_v57  ;;  %v1525_v0 = vsel %vm237_vm3, %v1350_v29, %v1990_v58  ;;  %v1924_v58 = vld [vmem:[#allocation10 + $0x18] sm:$0xff] }
 0xc90   :  { %1705 = vmatpush.bf16.msra.mxu0 %v1924_v58 }
 0xcba   :  { %v1994_v51 = vpop.permute.xlu2 %1993 }
 0xcbb   :  { %v1996_v60 = vunpack.i.h.bf16 %v1994_v51  ;;  %v1995_v61 = vunpack.i.l.bf16 %v1994_v51 }
 0xcbd   :  { %v1528_v2 = vsel %vm724_vm5, %v1526_v63, %v1996_v60  ;;  %v1527_v52 = vsel %vm724_vm5, %v1525_v0, %v1995_v61  ;;  %v1923_v60 = vld [vmem:[#allocation10 + $0x10] sm:$0xff] }
 0xcbe   :  { %1706 = vmatpush.bf16.msra.mxu0 %v1923_v60 }
 0xcda   :  { %v1999_v14 = vpop.permute.xlu0 %1998 }
 0xcdb   :  { %v2001_v1 = vunpack.i.h.bf16 %v1999_v14  ;;  %v2000_v15 = vunpack.i.l.bf16 %v1999_v14  ;;  %v2015_v14 = vld [vmem:[%s2741_s9 + $0x1] ss:$0 sm:$0xff] }
 0xcdd   :  { %v1530_v46 = vsel %vm727_vm6, %v1528_v2, %v2001_v1  ;;  %v1529_v47 = vsel %vm727_vm6, %v1527_v52, %v2000_v15 }
 0xcde   :  { %v1536_v3 = vpack.c.bf16 %v1530_v46, %v1529_v47  ;;  %v2016_v46 = vld [vmem:[%s2743_s11 + $0x1] ss:$0 sm:$0xff] }
 0xce0   :  { %1884 = vmatmul.msk.bf16.vlgmr.msrb.gmra.mxu2 %vm186_vm2, %v1536_v3 }
 0xd63   :  { %v1566_v16 = vpop.f32.mrf.mxu2 }
 0xd64   :  { %v1567_v53 = vadd.f32 %v2012_v4, %v1566_v16 }
 0xd66   :  { %v1571_v10 = vadd.f32 %v1567_v53, %v2554_v32 }
 0xd68   :  { %v1577_v5 = vsel %vm186_vm2, %v1571_v10, 0.0 }
 0xd69   :  { %1578 = vadd.xlane.f32.xlu1 %v1577_v5 }
 0xd6b   :  { %v1568_v6 = vpop.f32.mrf.mxu2 }
 0xd6c   :  { %v1569_v8 = vadd.f32 %v2012_v4, %v1568_v6 }
 0xd6e   :  { %v1572_v11 = vadd.f32 %v1569_v8, %v2556_v33  ;;  %v1922_v33 = vld [vmem:[#allocation8 + $0x18] sm:$0xff] }
 0xd6f   :  { %1663 = vmatpush.bf16.msrb.mxu3 %v1922_v33 }
 0xd70   :  { %v1580_v12 = vsel %vm186_vm2, %v1572_v11, 0.0 }
 0xd71   :  { %1581 = vadd.xlane.f32.xlu2 %v1580_v12 }
 0xd73   :  { %1664 = vmatpush.bf16.msrb.mxu3 %v1921_v27 }
 0xddc   :  { %v1579_v13 = vpop.xlane.xlu1 %1578 }
 0xddd   :  { %v1583_v17 = vmul.f32 %v1579_v13, %v2518_v62 }
 0xddf   :  { %v1585_v18 = vsub.f32 %v1571_v10, %v1583_v17 }
 0xde1   :  { %v1587_v19 = vmul.f32 %v1585_v18, %v1585_v18 }
 0xde3   :  { %v1589_v20 = vsel %vm186_vm2, %v1587_v19, 0.0 }
 0xde4   :  { %v1582_v7 = vpop.xlane.xlu2 %1581  ;;  %1590 = vadd.xlane.f32.xlu0 %v1589_v20 }
 0xde5   :  { %v1584_v32 = vmul.f32 %v1582_v7, %v2518_v62 }
 0xde7   :  { %v1586_v21 = vsub.f32 %v1572_v11, %v1584_v32 }
 0xde9   :  { %v1588_v22 = vmul.f32 %v1586_v21, %v1586_v21 }
 0xdeb   :  { %v1592_v23 = vsel %vm186_vm2, %v1588_v22, 0.0 }
 0xdec   :  { %1593 = vadd.xlane.f32.xlu1 %v1592_v23 }
 0xe57   :  { %v1591_v24 = vpop.xlane.xlu0 %1590 }
 0xe58   :  { %v1595_v25 = vmul.f32 %v1591_v24, %v2518_v62 }
 0xe5a   :  { %v1597_v26 = vadd.f32 1e-05, %v1595_v25 }
 0xe5c   :  { %2093 = vrsqrt.f32 %v1597_v26  ;;  %vm1605_vm4 = vweird.f32 %v1597_v26 }
 0xe5f   :  { %v1594_v28 = vpop.xlane.xlu1 %1593 }
 0xe60   :  { %v1596_v29 = vmul.f32 %v1594_v28, %v2518_v62 }
 0xe62   :  { %v2094_v30 = vpop.eup %2093  ;;  %v1598_v59 = vadd.f32 1e-05, %v1596_v29 }
 0xe63   :  { %v1600_v31 = vmul.f32 %v2094_v30, %v1597_v26  ;;  %vm1606_vm3 = vweird.f32 %v2094_v30 }
 0xe64   :  { %2095 = vrsqrt.f32 %v1598_v59  ;;  %vm1607_vm5 = vmor %vm1605_vm4, %vm1606_vm3  ;;  %vm1615_vm9 = vweird.f32 %v1598_v59 }
 0xe65   :  { %v1601_v34 = vmul.f32 %v2094_v30, %v1600_v31 }
 0xe67   :  { %v1602_v35 = vmul.f32 0.5, %v1601_v34 }
 0xe69   :  { %v1603_v36 = vsub.f32 1.5, %v1602_v35  ;;  %v2017_v35 = vld [vmem:[%s2746_s14 + $0x1] ss:$0 sm:$0xff]  ;;  %s2268_s14 = smov [#allocation11]  }
 0xe6a   :  { %v2096_v37 = vpop.eup %2095  ;;  %s1779_s17 = sshll.u32 %s2268_s14, 4  ;;  %s1780_s17 = int_to_ptr.vmem [resolvable:$true] %s1779_s17 }
 0xe6b   :  { %v1604_v38 = vmul.f32 %v2094_v30, %v1603_v36  ;;  %v1610_v39 = vmul.f32 %v2096_v37, %v1598_v59  ;;  %vm1616_vm6 = vweird.f32 %v2096_v37 }
 0xe6c   :  { %vm1617_vm10 = vmor %vm1615_vm9, %vm1616_vm6 }
 0xe6d   :  { %v1611_v40 = vmul.f32 %v2096_v37, %v1610_v39  ;;  %v1608_v42 = vsel %vm1607_vm5, %v2094_v30, %v1604_v38 }
 0xe6e   :  { %v1619_v48 = vmul.f32 %v1608_v42, %v1585_v18 }
 0xe6f   :  { %v1612_v43 = vmul.f32 0.5, %v1611_v40 }
 0xe70   :  { %v1624_v54 = vmul.f32 %v2013_v45, %v1619_v48 }
 0xe71   :  { %v1613_v44 = vsub.f32 1.5, %v1612_v43 }
 0xe72   :  { %v1629_v55 = vadd.f32 %v2014_v49, %v1624_v54 }
 0xe73   :  { %v1614_v41 = vmul.f32 %v2096_v37, %v1613_v44 }
 0xe75   :  { %v1618_v9 = vsel %vm1617_vm10, %v2096_v37, %v1614_v41 }
 0xe76   :  { %v1620_v50 = vmul.f32 %v1618_v9, %v1586_v21 }
 0xe78   :  { %v1625_v56 = vmul.f32 %v2013_v45, %v1620_v50 }
 0xe7a   :  { %v1630_v51 = vadd.f32 %v2014_v49, %v1625_v56 }
 0xe7c   :  { %v1636_v57 = vpack.c.bf16 %v1630_v51, %v1629_v55 }
 0xe7e   :  { %1896 = vmatmul.msk.bf16.vlgmr.msrb.gmra.mxu3 %vm186_vm2, %v1636_v57 }
 0xf01   :  { %v1666_v61 = vpop.f32.mrf.mxu3 }
 0xf02   :  { %v1667_v63 = vadd.f32 %v2015_v14, %v1666_v61 }
 0xf04   :  { %v1671_v15 = vmax.f32 %v1667_v63, 0.0 }
 0xf09   :  { %v1668_v0 = vpop.f32.mrf.mxu3 }
 0xf0a   :  { %v1669_v1 = vadd.f32 %v2015_v14, %v1668_v0 }
 0xf0c   :  { %v1672_v2 = vmax.f32 %v1669_v1, 0.0 }
 0xf0e   :  { %v1678_v52 = vpack.c.bf16 %v1672_v2, %v1671_v15 }
 0xf10   :  { %1906 = vmatmul.msk.bf16.vlgmr.msra.gmra.mxu0 %vm186_vm2, %v1678_v52 }
 0xf8d   :  { %v1708_v47 = vpop.f32.mrf.mxu0 }
 0xf8e   :  { %v1709_v3 = vadd.f32 %v2016_v46, %v1708_v47 }
 0xf90   :  { %v1713_v4 = vadd.f32 %v1709_v3, %v1629_v55 }
 0xf92   :  { %v1719_v16 = vsel %vm186_vm2, %v1713_v4, 0.0 }
 0xf93   :  { %1720 = vadd.xlane.f32.xlu2 %v1719_v16 }
 0xf95   :  { %v1710_v53 = vpop.f32.mrf.mxu0 }
 0xf96   :  { %v1711_v10 = vadd.f32 %v2016_v46, %v1710_v53 }
 0xf98   :  { %v1714_v5 = vadd.f32 %v1711_v10, %v1630_v51 }
 0xf9a   :  { %v1722_v6 = vsel %vm186_vm2, %v1714_v5, 0.0 }
 0xf9b   :  { %1723 = vadd.xlane.f32.xlu0 %v1722_v6 }
0x1006   :  { %v1721_v8 = vpop.xlane.xlu2 %1720 }
0x1007   :  { %v1725_v11 = vmul.f32 %v1721_v8, %v2518_v62 }
0x1009   :  { %v1727_v12 = vsub.f32 %v1713_v4, %v1725_v11 }
0x100b   :  { %v1729_v13 = vmul.f32 %v1727_v12, %v1727_v12 }
0x100d   :  { %v1731_v17 = vsel %vm186_vm2, %v1729_v13, 0.0 }
0x100e   :  { %v1724_v18 = vpop.xlane.xlu0 %1723  ;;  %1732 = vadd.xlane.f32.xlu1 %v1731_v17 }
0x100f   :  { %v1726_v19 = vmul.f32 %v1724_v18, %v2518_v62 }
0x1011   :  { %v1728_v20 = vsub.f32 %v1714_v5, %v1726_v19 }
0x1013   :  { %v1730_v7 = vmul.f32 %v1728_v20, %v1728_v20 }
0x1015   :  { %v1734_v32 = vsel %vm186_vm2, %v1730_v7, 0.0 }
0x1016   :  { %1735 = vadd.xlane.f32.xlu2 %v1734_v32 }
0x1081   :  { %v1733_v21 = vpop.xlane.xlu1 %1732 }
0x1082   :  { %v1737_v22 = vmul.f32 %v1733_v21, %v2518_v62 }
0x1084   :  { %v1739_v23 = vadd.f32 1e-05, %v1737_v22 }
0x1086   :  { %2097 = vrsqrt.f32 %v1739_v23  ;;  %vm1747_vm12 = vweird.f32 %v1739_v23 }
0x1089   :  { %v1736_v33 = vpop.xlane.xlu2 %1735 }
0x108a   :  { %v1738_v24 = vmul.f32 %v1736_v33, %v2518_v62  ;;  %v2018_v62 = vld [vmem:[%s2747_s15 + $0x1] ss:$0 sm:$0xff]  ;;  %s2269_s15 = smov 128  }
0x108c   :  { %v2098_v25 = vpop.eup %2097  ;;  %v1740_v26 = vadd.f32 1e-05, %v1738_v24 }
0x108d   :  { %v1742_v27 = vmul.f32 %v2098_v25, %v1739_v23  ;;  %vm1748_vm11 = vweird.f32 %v2098_v25 }
0x108e   :  { %2099 = vrsqrt.f32 %v1740_v26  ;;  %vm1749_vm13 = vmor %vm1747_vm12, %vm1748_vm11  ;;  %vm1757_vm15 = vweird.f32 %v1740_v26 }
0x108f   :  { %v1743_v28 = vmul.f32 %v2098_v25, %v1742_v27 }
0x1091   :  { %v1744_v29 = vmul.f32 0.5, %v1743_v28 }
0x1093   :  { %v1745_v30 = vsub.f32 1.5, %v1744_v29 }
0x1094   :  { %v2100_v59 = vpop.eup %2099 }
0x1095   :  { %v1746_v31 = vmul.f32 %v2098_v25, %v1745_v30  ;;  %v1752_v34 = vmul.f32 %v2100_v59, %v1740_v26  ;;  %vm1758_vm14 = vweird.f32 %v2100_v59 }
0x1096   :  { %vm1759_vm0 = vmor %vm1757_vm15, %vm1758_vm14 }
0x1097   :  { %v1750_v36 = vsel %vm1749_vm13, %v2098_v25, %v1746_v31  ;;  %v1753_v37 = vmul.f32 %v2100_v59, %v1752_v34 }
0x1098   :  { %v1761_v38 = vmul.f32 %v1750_v36, %v1727_v12 }
0x1099   :  { %v1754_v39 = vmul.f32 0.5, %v1753_v37 }
0x109a   :  { %v1766_v40 = vmul.f32 %v2017_v35, %v1761_v38 }
0x109b   :  { %v1755_v42 = vsub.f32 1.5, %v1754_v39 }
0x109c   :  { %v1771_v43 = vadd.f32 %v2018_v62, %v1766_v40 }
0x109d   :  { %v1756_v44 = vmul.f32 %v2100_v59, %v1755_v42 }
0x109e   :  { %1773 = vst.msk [vmem:[#allocation11] sm:$0xff] %vm186_vm2, %v1771_v43 }
0x109f   :  { %v1760_v45 = vsel %vm1759_vm0, %v2100_v59, %v1756_v44 }
0x10a0   :  { %v1762_v48 = vmul.f32 %v1760_v45, %v1728_v20 }
0x10a2   :  { %v1767_v41 = vmul.f32 %v2017_v35, %v1762_v48 }
0x10a4   :  { %v1772_v9 = vadd.f32 %v2018_v62, %v1767_v41 }
0x10a6   :  { %1774 = vst.msk [vmem:[#allocation11 + $0x8] sm:$0xff] %vm186_vm2, %v1772_v9 }
0x10a7   :  { %1787 = dma.vmem_to_hbm [thread:$0]  %s1780_s17, 256, %s1782_s4, [#allocation4], %s2269_s15, %s2269_s15, %s2264_s27  }
0x10a8   :  { %2251 = dma.done.wait [#allocation4], 256  }
0x10a9   :  { %2252 = vsyncadd [#allocation4], 4294967040 }
0x10aa   :  { %1792 = vsyncpa [#allocation3], 1 }
0x10ab   :  { %1793 = vsyncpa [#allocation6], 1 }
0x10ac   :  { %1794 = vsyncpa [#allocation9], 1 }
0x10ad   :  { %1795 = vsyncpa [#allocation4], 1 }

</bundles_post_ra>
